<compile_context>
chip_gen: v7x
topology: tpu7x:2x2x1
jax: 0.10.0
libtpu: 0.0.40
codegen_flags: <defaults>
</compile_context>

<pallas_src>
import numpy as np
import jax
import jax.numpy as jnp
from jax.experimental import pallas as pl
from jax.experimental.pallas import tpu as pltpu

# Match PyTorch f32 numerics for the MXU matmuls (kernel body and reference
# are traced under this config).
jax.config.update("jax_default_matmul_precision", "highest")


# ----------------------------- Pallas kernel -------------------------------

def _fused_cae_kernel(x_ref,
                      m1_ref, c1_ref,          # conv1 Toeplitz (BN + bias folded)
                      m2_ref, c2_ref,          # conv2 Toeplitz
                      wl1_ref, bl1_ref,        # l1
                      wlc_ref, blc_ref,        # lc
                      wl2_ref, bl2_ref,        # l2
                      m3_ref, c3_ref,          # deconv1 (BN + bias folded)
                      m4_ref, c4_ref,          # deconv2 + nearest upsample folded
                      recon_ref, logp_ref):
    f32 = jnp.float32
    x = x_ref[...]

    # ---------------- encoder conv stack ----------------
    h1 = jnp.dot(x, m1_ref[...], preferred_element_type=f32) + c1_ref[...]
    h1 = jnp.maximum(h1, 0.0)                       # Conv1d(1,C,7,6)+BN+ReLU
    x1 = jnp.dot(h1, m2_ref[...], preferred_element_type=f32) + c2_ref[...]
    x1 = jnp.tanh(x1)                               # Conv1d(C,2C,5,4)+Tanh; == torch flatten order

    # ---------------- latent heads ----------------
    code = jnp.tanh(jnp.dot(x1, wl1_ref[...], preferred_element_type=f32) + bl1_ref[...])
    logits = jnp.dot(x1, wlc_ref[...], preferred_element_type=f32) + blc_ref[...]
    m = jnp.max(logits, axis=-1, keepdims=True)
    logp_ref[...] = logits - m - jnp.log(
        jnp.sum(jnp.exp(logits - m), axis=-1, keepdims=True))

    # ---------------- decoder ----------------
    d0 = jnp.maximum(jnp.dot(code, wl2_ref[...], preferred_element_type=f32) + bl2_ref[...], 0.0)
    g1 = jnp.maximum(jnp.dot(d0, m3_ref[...], preferred_element_type=f32) + c3_ref[...], 0.0)
    # ConvTranspose1d(C,1,7,6) + Tanh + Upsample(in_features) in one matmul
    recon_ref[...] = jnp.tanh(
        jnp.dot(g1, m4_ref[...], preferred_element_type=f32) + c4_ref[...])


# -------------------- parameter init (PyTorch layout) ----------------------

def init_params(key, in_features, out_classes, complexity=2, latent_space=16):
    C = complexity
    L1 = (in_features - 7) // 6 + 1
    L2 = (L1 - 5) // 4 + 1
    flat = 2 * C * L2

    def unif(k, shape, fan_in):
        bound = 1.0 / (fan_in ** 0.5)
        return jax.random.uniform(k, shape, jnp.float32, -bound, bound)

    ks = jax.random.split(key, 16)
    p = {}
    # conv: Conv1d(1, C, 7, 6), BN(C), Conv1d(C, 2C, 5, 4)
    p["w_conv1"] = unif(ks[0], (C, 1, 7), 7)
    p["b_conv1"] = unif(ks[1], (C,), 7)
    p["bn1_gamma"] = 1.0 + 0.1 * jnp.arange(C, dtype=jnp.float32)
    p["bn1_beta"] = 0.05 * jnp.arange(C, dtype=jnp.float32)
    p["bn1_mean"] = 0.01 * jnp.arange(C, dtype=jnp.float32)
    p["bn1_var"] = jnp.ones((C,), jnp.float32)
    p["w_conv2"] = unif(ks[2], (2 * C, C, 5), C * 5)
    p["b_conv2"] = unif(ks[3], (2 * C,), C * 5)
    # linear heads (stored as (in, out))
    p["w_l1"] = unif(ks[4], (flat, latent_space), flat)
    p["b_l1"] = unif(ks[5], (latent_space,), flat)
    p["w_lc"] = unif(ks[6], (flat, out_classes), flat)
    p["b_lc"] = unif(ks[7], (out_classes,), flat)
    p["w_l2"] = unif(ks[8], (latent_space, flat), latent_space)
    p["b_l2"] = unif(ks[9], (flat,), latent_space)
    # deconv: ConvTranspose1d(2C, C, 5, 4), BN(C), ConvTranspose1d(C, 1, 7, 6)
    p["w_dec1"] = unif(ks[10], (2 * C, C, 5), 2 * C * 5)
    p["b_dec1"] = unif(ks[11], (C,), 2 * C * 5)
    p["bn2_gamma"] = 1.0 - 0.05 * jnp.arange(C, dtype=jnp.float32)
    p["bn2_beta"] = -0.02 * jnp.arange(C, dtype=jnp.float32)
    p["bn2_mean"] = 0.005 * jnp.arange(C, dtype=jnp.float32)
    p["bn2_var"] = 1.5 * jnp.ones((C,), jnp.float32)
    p["w_dec2"] = unif(ks[12], (C, 1, 7), C * 7)
    p["b_dec2"] = unif(ks[13], (1,), C * 7)
    return p


# ---------- fold params into kernel-ready operators (host-side, once) ------

def prepare_operators(params, in_features, complexity, eps=1e-5):
    """Build dense operator matrices (Toeplitz conv forms) with BN scale and
    biases folded in, and the nearest Upsample folded into the last operator.
    Done once OUTSIDE jit; only these matrices are fed to the kernel."""
    C = complexity
    L1 = (in_features - 7) // 6 + 1
    L2 = (L1 - 5) // 4 + 1
    Lt1 = (L2 - 1) * 4 + 5
    Lt2 = (Lt1 - 1) * 6 + 7

    p = {k: np.asarray(v, np.float64) for k, v in params.items()}
    s1 = p["bn1_gamma"] / np.sqrt(p["bn1_var"] + eps)
    t1 = p["bn1_beta"] - p["bn1_mean"] * s1
    s2 = p["bn2_gamma"] / np.sqrt(p["bn2_var"] + eps)
    t2 = p["bn2_beta"] - p["bn2_mean"] * s2

    # Conv1d(1, C, 7, stride 6) + BN1 folded -> (in_features, C*L1)
    M1 = np.zeros((in_features, C * L1))
    B1 = np.zeros((C * L1,))
    for c in range(C):
        for l in range(L1):
            col = c * L1 + l
            for t in range(7):
                M1[6 * l + t, col] += s1[c] * p["w_conv1"][c, 0, t]
            B1[col] = s1[c] * p["b_conv1"][c] + t1[c]

    # Conv1d(C, 2C, 5, stride 4) -> (C*L1, 2C*L2); column order (channel-major,
    # length-minor) == torch X1.reshape(bs, -1) order.
    M2 = np.zeros((C * L1, 2 * C * L2))
    B2 = np.zeros((2 * C * L2,))
    for c2 in range(2 * C):
        for l in range(L2):
            col = c2 * L2 + l
            for c1 in range(C):
                for t in range(5):
                    M2[c1 * L1 + 4 * l + t, col] += p["w_conv2"][c2, c1, t]
            B2[col] = p["b_conv2"][c2]

    # ConvTranspose1d(2C, C, 5, stride 4) + BN2 folded -> (2C*L2, C*Lt1)
    M3 = np.zeros((2 * C * L2, C * Lt1))
    B3 = np.zeros((C * Lt1,))
    for c in range(C):
        for c2 in range(2 * C):
            for l in range(L2):
                for t in range(5):
                    M3[c2 * L2 + l, c * Lt1 + 4 * l + t] += s2[c] * p["w_dec1"][c2, c, t]
        B3[c * Lt1:(c + 1) * Lt1] = s2[c] * p["b_dec1"][c] + t2[c]

    # ConvTranspose1d(C, 1, 7, stride 6) fused with Upsample(in_features,'nearest')
    # (tanh commutes with index duplication -> duplicate columns of the operator).
    M4 = np.zeros((C * Lt1, Lt2))
    for c in range(C):
        for l in range(Lt1):
            for t in range(7):
                M4[c * Lt1 + l, 6 * l + t] += p["w_dec2"][c, 0, t]
    src = (np.arange(in_features) * Lt2) // in_features
    M4up = M4[:, src]                              # (C*Lt1, in_features)
    B4 = np.full((in_features,), p["b_dec2"][0])

    ops = dict(M1=M1, B1=B1[None, :], M2=M2, B2=B2[None, :],
               Wl1=p["w_l1"], bl1=p["b_l1"][None, :],
               Wlc=p["w_lc"], blc=p["b_lc"][None, :],
               Wl2=p["w_l2"], bl2=p["b_l2"][None, :],
               M3=M3, B3=B3[None, :], M4=M4up, B4=B4[None, :])
    return {k: jnp.asarray(v, jnp.float32) for k, v in ops.items()}


# ------------------------------- forward -----------------------------------

_OP_ORDER = ("M1", "B1", "M2", "B2", "Wl1", "bl1", "Wlc", "blc",
             "Wl2", "bl2", "M3", "B3", "M4", "B4")


def make_forward(in_features, out_classes, complexity, latent_space):
    C = complexity
    L1 = (in_features - 7) // 6 + 1
    L2 = (L1 - 5) // 4 + 1
    flat = 2 * C * L2
    Lt1 = (L2 - 1) * 4 + 5

    def forward(ops, x):
        # x: (B, 1, in_features) float32 (NCL, as in PyTorch)
        B = x.shape[0]
        x2d = x.reshape(B, in_features)

        # Batch grid: single step at B=2; scales to big batches (parallel on
        # v7x megacore, pipelined DMA on v5e/v6e). Weights use constant
        # index_maps so they are fetched into VMEM only once.
        block_b = B if B <= 128 else 128
        grid = (pl.cdiv(B, block_b),)

        def _full(a):
            return pl.BlockSpec(a.shape, lambda i: (0, 0))

        in_specs = [pl.BlockSpec((block_b, in_features), lambda i: (i, 0))]
        in_specs += [_full(ops[k]) for k in _OP_ORDER]
        out_specs = (pl.BlockSpec((block_b, in_features), lambda i: (i, 0)),
                     pl.BlockSpec((block_b, out_classes), lambda i: (i, 0)))

        w_elems = sum(int(np.prod(ops[k].shape)) for k in _OP_ORDER)
        macs = (in_features * C * L1 + C * L1 * flat + flat * latent_space
                + flat * out_classes + latent_space * flat + flat * C * Lt1
                + C * Lt1 * in_features)
        cost = pl.CostEstimate(
            flops=2 * B * macs,
            transcendentals=B * (flat + latent_space + out_classes + in_features),
            bytes_accessed=4 * (w_elems + B * (2 * in_features + out_classes)))

        recon, logp = pl.pallas_call(
            _fused_cae_kernel,
            out_shape=(jax.ShapeDtypeStruct((B, in_features), jnp.float32),
                       jax.ShapeDtypeStruct((B, out_classes), jnp.float32)),
            grid=grid,
            in_specs=in_specs,
            out_specs=out_specs,
            compiler_params=pltpu.CompilerParams(
                dimension_semantics=("parallel",),
                vmem_limit_bytes=8 * 1024 * 1024),
            cost_estimate=cost,
        )(x2d, *[ops[k] for k in _OP_ORDER])

        return recon.reshape(B, 1, in_features), logp

    return forward


# --------------- pure-JAX (XLA) reference of the PyTorch module ------------

def _im2col_1d(x, k, s):
    B, L, Cc = x.shape
    Lo = (L - k) // s + 1
    idx = jnp.arange(Lo)[:, None] * s + jnp.arange(k)[None, :]
    return x[:, idx, :].reshape(B, Lo, k * Cc)


def _dilate_pad(x, s, pad):
    B, L, Cc = x.shape
    Ld = (L - 1) * s + 1
    d = jnp.zeros((B, Ld + 2 * pad, Cc), x.dtype)
    return d.at[:, pad:pad + Ld:s, :].set(x)


def reference_forward(params, x, in_features, out_classes, complexity, latent_space):
    C = complexity
    eps = 1e-5
    B = x.shape[0]
    L1 = (in_features - 7) // 6 + 1
    L2 = (L1 - 5) // 4 + 1
    Lt1 = (L2 - 1) * 4 + 5
    Lt2 = (Lt1 - 1) * 6 + 7
    flat = 2 * C * L2

    xl = jnp.transpose(x, (0, 2, 1))
    p1 = _im2col_1d(xl, 7, 6).reshape(B * L1, 7)
    w1 = jnp.transpose(params["w_conv1"], (2, 1, 0)).reshape(7, C)
    s1 = params["bn1_gamma"] / jnp.sqrt(params["bn1_var"] + eps)
    t1 = params["bn1_beta"] - params["bn1_mean"] * s1
    h1 = jnp.maximum((p1 @ w1 + params["b_conv1"]) * s1 + t1, 0.0).reshape(B, L1, C)

    p2 = _im2col_1d(h1, 5, 4).reshape(B * L2, 5 * C)
    w2 = jnp.transpose(params["w_conv2"], (2, 1, 0)).reshape(5 * C, 2 * C)
    h2 = jnp.tanh(p2 @ w2 + params["b_conv2"]).reshape(B, L2, 2 * C)
    x1_flat = jnp.transpose(h2, (0, 2, 1)).reshape(B, flat)

    code = jnp.tanh(x1_flat @ params["w_l1"] + params["b_l1"])
    logits = x1_flat @ params["w_lc"] + params["b_lc"]
    logp = jax.nn.log_softmax(logits, axis=-1)

    d0 = jnp.maximum(code @ params["w_l2"] + params["b_l2"], 0.0)
    d0 = jnp.transpose(d0.reshape(B, 2 * C, L2), (0, 2, 1))
    dd1 = _dilate_pad(d0, 4, 4)
    pd1 = _im2col_1d(dd1, 5, 1).reshape(B * Lt1, 5 * 2 * C)
    wt1 = jnp.transpose(params["w_dec1"][:, :, ::-1], (2, 0, 1)).reshape(5 * 2 * C, C)
    s2 = params["bn2_gamma"] / jnp.sqrt(params["bn2_var"] + eps)
    t2 = params["bn2_beta"] - params["bn2_mean"] * s2
    g1 = jnp.maximum((pd1 @ wt1 + params["b_dec1"]) * s2 + t2, 0.0).reshape(B, Lt1, C)

    dd2 = _dilate_pad(g1, 6, 6)
    pd2 = _im2col_1d(dd2, 7, 1).reshape(B * Lt2, 7 * C)
    wt2 = jnp.transpose(params["w_dec2"][:, :, ::-1], (2, 0, 1)).reshape(7 * C, 1)
    g2 = jnp.tanh(pd2 @ wt2 + params["b_dec2"]).reshape(B, Lt2)

    src = (jnp.arange(in_features) * Lt2) // in_features
    recon = g2[:, src].reshape(B, 1, in_features)
    return recon, logp


# --------------------------------- main -------------------------------------

if __name__ == "__main__":
    B = 2
    in_features = 256
    out_classes = 4
    complexity = 2
    latent_space = 16

    key = jax.random.PRNGKey(0)
    k_param, k_x = jax.random.split(key)
    params = init_params(k_param, in_features, out_classes, complexity, latent_space)
    x = jax.random.normal(k_x, (B, 1, in_features), jnp.float32)

    # fold weights into kernel-ready operators ONCE, outside jit
    ops = prepare_operators(params, in_features, complexity)

    fwd = jax.jit(make_forward(in_features, out_classes, complexity, latent_space))
    recon, logp = fwd(ops, x)
    jax.block_until_ready((recon, logp))

    assert recon.shape == (B, 1, in_features) and recon.dtype == jnp.float32
    assert logp.shape == (B, out_classes) and logp.dtype == jnp.float32
    # log_softmax rows must sum (in prob space) to 1
    assert bool(jnp.all(jnp.abs(jnp.sum(jnp.exp(logp), axis=1) - 1.0) < 1e-5))

    # numerical check against a pure-JAX reference of the PyTorch eval semantics
    recon_ref, logp_ref = reference_forward(
        params, x, in_features, out_classes, complexity, latent_space)
    assert bool(jnp.allclose(recon, recon_ref, atol=1e-4, rtol=1e-4))
    assert bool(jnp.allclose(logp, logp_ref, atol=1e-4, rtol=1e-4))

    print("KERNEL_OK")
</pallas_src>

<mosaic_0001>
module attributes {stable_mosaic.version = 11 : i64} {
  func.func @_fused_cae_kernel(%arg0: i32, %arg1: memref<2x256xf32, #tpu.memory_space<vmem>>, %arg2: memref<256x84xf32, #tpu.memory_space<vmem>>, %arg3: memref<1x84xf32, #tpu.memory_space<vmem>>, %arg4: memref<84x40xf32, #tpu.memory_space<vmem>>, %arg5: memref<1x40xf32, #tpu.memory_space<vmem>>, %arg6: memref<40x16xf32, #tpu.memory_space<vmem>>, %arg7: memref<1x16xf32, #tpu.memory_space<vmem>>, %arg8: memref<40x4xf32, #tpu.memory_space<vmem>>, %arg9: memref<1x4xf32, #tpu.memory_space<vmem>>, %arg10: memref<16x40xf32, #tpu.memory_space<vmem>>, %arg11: memref<1x40xf32, #tpu.memory_space<vmem>>, %arg12: memref<40x82xf32, #tpu.memory_space<vmem>>, %arg13: memref<1x82xf32, #tpu.memory_space<vmem>>, %arg14: memref<82x256xf32, #tpu.memory_space<vmem>>, %arg15: memref<1x256xf32, #tpu.memory_space<vmem>>, %arg16: memref<2x256xf32, #tpu.memory_space<vmem>>, %arg17: memref<2x4xf32, #tpu.memory_space<vmem>>) attributes {dimension_semantics = [#tpu.dimension_semantics<parallel>], iteration_bounds = array<i64: 1>, scalar_prefetch = 0 : i64, scratch_operands = 0 : i64, tpu.core_type = #tpu.core_type<tc>, window_params = [{transform_indices = @transform_0, window_bounds = array<i64: 2, 256>}, {pipeline_mode = #tpu.pipeline_mode<synchronous>, transform_indices = @transform_1, window_bounds = array<i64: 256, 84>}, {pipeline_mode = #tpu.pipeline_mode<synchronous>, transform_indices = @transform_2, window_bounds = array<i64: 1, 84>}, {pipeline_mode = #tpu.pipeline_mode<synchronous>, transform_indices = @transform_3, window_bounds = array<i64: 84, 40>}, {pipeline_mode = #tpu.pipeline_mode<synchronous>, transform_indices = @transform_4, window_bounds = array<i64: 1, 40>}, {pipeline_mode = #tpu.pipeline_mode<synchronous>, transform_indices = @transform_5, window_bounds = array<i64: 40, 16>}, {pipeline_mode = #tpu.pipeline_mode<synchronous>, transform_indices = @transform_6, window_bounds = array<i64: 1, 16>}, {pipeline_mode = #tpu.pipeline_mode<synchronous>, transform_indices = @transform_7, window_bounds = array<i64: 40, 4>}, {pipeline_mode = #tpu.pipeline_mode<synchronous>, transform_indices = @transform_8, window_bounds = array<i64: 1, 4>}, {pipeline_mode = #tpu.pipeline_mode<synchronous>, transform_indices = @transform_9, window_bounds = array<i64: 16, 40>}, {pipeline_mode = #tpu.pipeline_mode<synchronous>, transform_indices = @transform_10, window_bounds = array<i64: 1, 40>}, {pipeline_mode = #tpu.pipeline_mode<synchronous>, transform_indices = @transform_11, window_bounds = array<i64: 40, 82>}, {pipeline_mode = #tpu.pipeline_mode<synchronous>, transform_indices = @transform_12, window_bounds = array<i64: 1, 82>}, {pipeline_mode = #tpu.pipeline_mode<synchronous>, transform_indices = @transform_13, window_bounds = array<i64: 82, 256>}, {pipeline_mode = #tpu.pipeline_mode<synchronous>, transform_indices = @transform_14, window_bounds = array<i64: 1, 256>}, {transform_indices = @transform_15, window_bounds = array<i64: 2, 256>}, {transform_indices = @transform_16, window_bounds = array<i64: 2, 4>}]} {
    %c0 = arith.constant 0 : index
    %c0_0 = arith.constant 0 : index
    %0 = vector.load %arg1[%c0, %c0_0] : memref<2x256xf32, #tpu.memory_space<vmem>>, vector<2x256xf32>
    %c0_1 = arith.constant 0 : index
    %c0_2 = arith.constant 0 : index
    %1 = vector.load %arg2[%c0_1, %c0_2] : memref<256x84xf32, #tpu.memory_space<vmem>>, vector<256x84xf32>
    %cst = arith.constant dense<0.000000e+00> : vector<2x84xf32>
    %2 = tpu.matmul %0, %1, %cst {dimension_numbers = #tpu.dot_dimension_numbers<[1], [0], [0], [1], [0, 0, 1, 1], [], []>, precision = #tpu.contract_precision<fp32>} : vector<2x256xf32>, vector<256x84xf32>, vector<2x84xf32> -> vector<2x84xf32>
    %c0_3 = arith.constant 0 : index
    %c0_4 = arith.constant 0 : index
    %3 = vector.load %arg3[%c0_3, %c0_4] : memref<1x84xf32, #tpu.memory_space<vmem>>, vector<1x84xf32>
    %4 = vector.broadcast %3 : vector<1x84xf32> to vector<2x84xf32>
    %5 = arith.addf %2, %4 : vector<2x84xf32>
    %cst_5 = arith.constant 0.000000e+00 : f32
    %6 = vector.broadcast %cst_5 : f32 to vector<2x84xf32>
    %7 = arith.maximumf %5, %6 : vector<2x84xf32>
    %c0_6 = arith.constant 0 : index
    %c0_7 = arith.constant 0 : index
    %8 = vector.load %arg4[%c0_6, %c0_7] : memref<84x40xf32, #tpu.memory_space<vmem>>, vector<84x40xf32>
    %cst_8 = arith.constant dense<0.000000e+00> : vector<2x40xf32>
    %9 = tpu.matmul %7, %8, %cst_8 {dimension_numbers = #tpu.dot_dimension_numbers<[1], [0], [0], [1], [0, 0, 1, 1], [], []>, precision = #tpu.contract_precision<fp32>} : vector<2x84xf32>, vector<84x40xf32>, vector<2x40xf32> -> vector<2x40xf32>
    %c0_9 = arith.constant 0 : index
    %c0_10 = arith.constant 0 : index
    %10 = vector.load %arg5[%c0_9, %c0_10] : memref<1x40xf32, #tpu.memory_space<vmem>>, vector<1x40xf32>
    %11 = vector.broadcast %10 : vector<1x40xf32> to vector<2x40xf32>
    %12 = arith.addf %9, %11 : vector<2x40xf32>
    %13 = math.tanh %12 : vector<2x40xf32>
    %c0_11 = arith.constant 0 : index
    %c0_12 = arith.constant 0 : index
    %14 = vector.load %arg6[%c0_11, %c0_12] : memref<40x16xf32, #tpu.memory_space<vmem>>, vector<40x16xf32>
    %cst_13 = arith.constant dense<0.000000e+00> : vector<2x16xf32>
    %15 = tpu.matmul %13, %14, %cst_13 {dimension_numbers = #tpu.dot_dimension_numbers<[1], [0], [0], [1], [0, 0, 1, 1], [], []>, precision = #tpu.contract_precision<fp32>} : vector<2x40xf32>, vector<40x16xf32>, vector<2x16xf32> -> vector<2x16xf32>
    %c0_14 = arith.constant 0 : index
    %c0_15 = arith.constant 0 : index
    %16 = vector.load %arg7[%c0_14, %c0_15] : memref<1x16xf32, #tpu.memory_space<vmem>>, vector<1x16xf32>
    %17 = vector.broadcast %16 : vector<1x16xf32> to vector<2x16xf32>
    %18 = arith.addf %15, %17 : vector<2x16xf32>
    %19 = math.tanh %18 : vector<2x16xf32>
    %c0_16 = arith.constant 0 : index
    %c0_17 = arith.constant 0 : index
    %20 = vector.load %arg8[%c0_16, %c0_17] : memref<40x4xf32, #tpu.memory_space<vmem>>, vector<40x4xf32>
    %cst_18 = arith.constant dense<0.000000e+00> : vector<2x4xf32>
    %21 = tpu.matmul %13, %20, %cst_18 {dimension_numbers = #tpu.dot_dimension_numbers<[1], [0], [0], [1], [0, 0, 1, 1], [], []>, precision = #tpu.contract_precision<fp32>} : vector<2x40xf32>, vector<40x4xf32>, vector<2x4xf32> -> vector<2x4xf32>
    %c0_19 = arith.constant 0 : index
    %c0_20 = arith.constant 0 : index
    %22 = vector.load %arg9[%c0_19, %c0_20] : memref<1x4xf32, #tpu.memory_space<vmem>>, vector<1x4xf32>
    %23 = vector.broadcast %22 : vector<1x4xf32> to vector<2x4xf32>
    %24 = arith.addf %21, %23 : vector<2x4xf32>
    %cst_21 = arith.constant dense<0xFF800000> : vector<2xf32>
    %25 = vector.multi_reduction <maximumf>, %24, %cst_21 [1] : vector<2x4xf32> to vector<2xf32>
    %26 = vector.shape_cast %25 : vector<2xf32> to vector<2x1xf32>
    %27 = vector.broadcast %26 : vector<2x1xf32> to vector<2x4xf32>
    %28 = arith.subf %24, %27 : vector<2x4xf32>
    %29 = vector.broadcast %26 : vector<2x1xf32> to vector<2x4xf32>
    %30 = arith.subf %24, %29 : vector<2x4xf32>
    %31 = math.exp %30 : vector<2x4xf32>
    %cst_22 = arith.constant dense<0.000000e+00> : vector<2xf32>
    %32 = vector.multi_reduction <add>, %31, %cst_22 [1] : vector<2x4xf32> to vector<2xf32>
    %33 = vector.shape_cast %32 : vector<2xf32> to vector<2x1xf32>
    %34 = math.log %33 : vector<2x1xf32>
    %35 = vector.broadcast %34 : vector<2x1xf32> to vector<2x4xf32>
    %36 = arith.subf %28, %35 : vector<2x4xf32>
    %c0_23 = arith.constant 0 : index
    %c0_24 = arith.constant 0 : index
    %37 = vector.load %arg17[%c0_23, %c0_24] : memref<2x4xf32, #tpu.memory_space<vmem>>, vector<2x4xf32>
    tpu.vector_store %arg17[%c0_23, %c0_24], %36 {strides = array<i32>} : memref<2x4xf32, #tpu.memory_space<vmem>>, vector<2x4xf32>,
    %c0_25 = arith.constant 0 : index
    %c0_26 = arith.constant 0 : index
    %38 = vector.load %arg10[%c0_25, %c0_26] : memref<16x40xf32, #tpu.memory_space<vmem>>, vector<16x40xf32>
    %cst_27 = arith.constant dense<0.000000e+00> : vector<2x40xf32>
    %39 = tpu.matmul %19, %38, %cst_27 {dimension_numbers = #tpu.dot_dimension_numbers<[1], [0], [0], [1], [0, 0, 1, 1], [], []>, precision = #tpu.contract_precision<fp32>} : vector<2x16xf32>, vector<16x40xf32>, vector<2x40xf32> -> vector<2x40xf32>
    %c0_28 = arith.constant 0 : index
    %c0_29 = arith.constant 0 : index
    %40 = vector.load %arg11[%c0_28, %c0_29] : memref<1x40xf32, #tpu.memory_space<vmem>>, vector<1x40xf32>
    %41 = vector.broadcast %40 : vector<1x40xf32> to vector<2x40xf32>
    %42 = arith.addf %39, %41 : vector<2x40xf32>
    %cst_30 = arith.constant 0.000000e+00 : f32
    %43 = vector.broadcast %cst_30 : f32 to vector<2x40xf32>
    %44 = arith.maximumf %42, %43 : vector<2x40xf32>
    %c0_31 = arith.constant 0 : index
    %c0_32 = arith.constant 0 : index
    %45 = vector.load %arg12[%c0_31, %c0_32] : memref<40x82xf32, #tpu.memory_space<vmem>>, vector<40x82xf32>
    %cst_33 = arith.constant dense<0.000000e+00> : vector<2x82xf32>
    %46 = tpu.matmul %44, %45, %cst_33 {dimension_numbers = #tpu.dot_dimension_numbers<[1], [0], [0], [1], [0, 0, 1, 1], [], []>, precision = #tpu.contract_precision<fp32>} : vector<2x40xf32>, vector<40x82xf32>, vector<2x82xf32> -> vector<2x82xf32>
    %c0_34 = arith.constant 0 : index
    %c0_35 = arith.constant 0 : index
    %47 = vector.load %arg13[%c0_34, %c0_35] : memref<1x82xf32, #tpu.memory_space<vmem>>, vector<1x82xf32>
    %48 = vector.broadcast %47 : vector<1x82xf32> to vector<2x82xf32>
    %49 = arith.addf %46, %48 : vector<2x82xf32>
    %cst_36 = arith.constant 0.000000e+00 : f32
    %50 = vector.broadcast %cst_36 : f32 to vector<2x82xf32>
    %51 = arith.maximumf %49, %50 : vector<2x82xf32>
    %c0_37 = arith.constant 0 : index
    %c0_38 = arith.constant 0 : index
    %52 = vector.load %arg14[%c0_37, %c0_38] : memref<82x256xf32, #tpu.memory_space<vmem>>, vector<82x256xf32>
    %cst_39 = arith.constant dense<0.000000e+00> : vector<2x256xf32>
    %53 = tpu.matmul %51, %52, %cst_39 {dimension_numbers = #tpu.dot_dimension_numbers<[1], [0], [0], [1], [0, 0, 1, 1], [], []>, precision = #tpu.contract_precision<fp32>} : vector<2x82xf32>, vector<82x256xf32>, vector<2x256xf32> -> vector<2x256xf32>
    %c0_40 = arith.constant 0 : index
    %c0_41 = arith.constant 0 : index
    %54 = vector.load %arg15[%c0_40, %c0_41] : memref<1x256xf32, #tpu.memory_space<vmem>>, vector<1x256xf32>
    %55 = vector.broadcast %54 : vector<1x256xf32> to vector<2x256xf32>
    %56 = arith.addf %53, %55 : vector<2x256xf32>
    %57 = math.tanh %56 : vector<2x256xf32>
    %c0_42 = arith.constant 0 : index
    %c0_43 = arith.constant 0 : index
    %58 = vector.load %arg16[%c0_42, %c0_43] : memref<2x256xf32, #tpu.memory_space<vmem>>, vector<2x256xf32>
    tpu.vector_store %arg16[%c0_42, %c0_43], %57 {strides = array<i32>} : memref<2x256xf32, #tpu.memory_space<vmem>>, vector<2x256xf32>,
    return
  }
  func.func @transform_0(%arg0: i32) -> (i32, i32) {
    %c0_i32 = arith.constant 0 : i32
    %c0_i32_0 = arith.constant 0 : i32
    return %arg0, %c0_i32 : i32, i32
  }
  func.func @transform_1(%arg0: i32) -> (i32, i32) {
    %c0_i32 = arith.constant 0 : i32
    %c0_i32_0 = arith.constant 0 : i32
    %c0_i32_1 = arith.constant 0 : i32
    return %c0_i32, %c0_i32_0 : i32, i32
  }
  func.func @transform_2(%arg0: i32) -> (i32, i32) {
    %c0_i32 = arith.constant 0 : i32
    %c0_i32_0 = arith.constant 0 : i32
    %c0_i32_1 = arith.constant 0 : i32
    return %c0_i32, %c0_i32_0 : i32, i32
  }
  func.func @transform_3(%arg0: i32) -> (i32, i32) {
    %c0_i32 = arith.constant 0 : i32
    %c0_i32_0 = arith.constant 0 : i32
    %c0_i32_1 = arith.constant 0 : i32
    return %c0_i32, %c0_i32_0 : i32, i32
  }
  func.func @transform_4(%arg0: i32) -> (i32, i32) {
    %c0_i32 = arith.constant 0 : i32
    %c0_i32_0 = arith.constant 0 : i32
    %c0_i32_1 = arith.constant 0 : i32
    return %c0_i32, %c0_i32_0 : i32, i32
  }
  func.func @transform_5(%arg0: i32) -> (i32, i32) {
    %c0_i32 = arith.constant 0 : i32
    %c0_i32_0 = arith.constant 0 : i32
    %c0_i32_1 = arith.constant 0 : i32
    return %c0_i32, %c0_i32_0 : i32, i32
  }
  func.func @transform_6(%arg0: i32) -> (i32, i32) {
    %c0_i32 = arith.constant 0 : i32
    %c0_i32_0 = arith.constant 0 : i32
    %c0_i32_1 = arith.constant 0 : i32
    return %c0_i32, %c0_i32_0 : i32, i32
  }
  func.func @transform_7(%arg0: i32) -> (i32, i32) {
    %c0_i32 = arith.constant 0 : i32
    %c0_i32_0 = arith.constant 0 : i32
    %c0_i32_1 = arith.constant 0 : i32
    return %c0_i32, %c0_i32_0 : i32, i32
  }
  func.func @transform_8(%arg0: i32) -> (i32, i32) {
    %c0_i32 = arith.constant 0 : i32
    %c0_i32_0 = arith.constant 0 : i32
    %c0_i32_1 = arith.constant 0 : i32
    return %c0_i32, %c0_i32_0 : i32, i32
  }
  func.func @transform_9(%arg0: i32) -> (i32, i32) {
    %c0_i32 = arith.constant 0 : i32
    %c0_i32_0 = arith.constant 0 : i32
    %c0_i32_1 = arith.constant 0 : i32
    return %c0_i32, %c0_i32_0 : i32, i32
  }
  func.func @transform_10(%arg0: i32) -> (i32, i32) {
    %c0_i32 = arith.constant 0 : i32
    %c0_i32_0 = arith.constant 0 : i32
    %c0_i32_1 = arith.constant 0 : i32
    return %c0_i32, %c0_i32_0 : i32, i32
  }
  func.func @transform_11(%arg0: i32) -> (i32, i32) {
    %c0_i32 = arith.constant 0 : i32
    %c0_i32_0 = arith.constant 0 : i32
    %c0_i32_1 = arith.constant 0 : i32
    return %c0_i32, %c0_i32_0 : i32, i32
  }
  func.func @transform_12(%arg0: i32) -> (i32, i32) {
    %c0_i32 = arith.constant 0 : i32
    %c0_i32_0 = arith.constant 0 : i32
    %c0_i32_1 = arith.constant 0 : i32
    return %c0_i32, %c0_i32_0 : i32, i32
  }
  func.func @transform_13(%arg0: i32) -> (i32, i32) {
    %c0_i32 = arith.constant 0 : i32
    %c0_i32_0 = arith.constant 0 : i32
    %c0_i32_1 = arith.constant 0 : i32
    return %c0_i32, %c0_i32_0 : i32, i32
  }
  func.func @transform_14(%arg0: i32) -> (i32, i32) {
    %c0_i32 = arith.constant 0 : i32
    %c0_i32_0 = arith.constant 0 : i32
    %c0_i32_1 = arith.constant 0 : i32
    return %c0_i32, %c0_i32_0 : i32, i32
  }
  func.func @transform_15(%arg0: i32) -> (i32, i32) {
    %c0_i32 = arith.constant 0 : i32
    %c0_i32_0 = arith.constant 0 : i32
    return %arg0, %c0_i32 : i32, i32
  }
  func.func @transform_16(%arg0: i32) -> (i32, i32) {
    %c0_i32 = arith.constant 0 : i32
    %c0_i32_0 = arith.constant 0 : i32
    return %arg0, %c0_i32 : i32, i32
  }
}

</mosaic_0001>

<bundles_post_ra>
// kernel: forward.1
= control target key start
LH: loop header
LB: loop body
LE: loop exit
PB: predicated region body
PF: predicated region fallthrough
CT: control target
= control target key end

     0   :  { %s7353_s0 = inlined_call_operand.vmem [shape: f32[2,256], index: 0, kind: input, shape index: {}]   ;;  %s7354_s1 = inlined_call_operand.vmem [shape: f32[256,84], index: 1, kind: input, shape index: {}]   ;;  %s7355_s2 = inlined_call_operand.vmem [shape: f32[1,84], index: 2, kind: input, shape index: {}]   ;;  %s7356_s3 = inlined_call_operand.vmem [shape: f32[84,40], index: 3, kind: input, shape index: {}]   ;;  %s7357_s4 = inlined_call_operand.vmem [shape: f32[1,40], index: 4, kind: input, shape index: {}]   ;;  %s7358_s5 = inlined_call_operand.vmem [shape: f32[40,16], index: 5, kind: input, shape index: {}]   ;;  %s7359_s6 = inlined_call_operand.vmem [shape: f32[1,16], index: 6, kind: input, shape index: {}]   ;;  %s7360_s7 = inlined_call_operand.vmem [shape: f32[40,4], index: 7, kind: input, shape index: {}]   ;;  %s7361_s8 = inlined_call_operand.vmem [shape: f32[1,4], index: 8, kind: input, shape index: {}]   ;;  %s7362_s9 = inlined_call_operand.vmem [shape: f32[16,40], index: 9, kind: input, shape index: {}]   ;;  %s7363_s10 = inlined_call_operand.vmem [shape: f32[1,40], index: 10, kind: input, shape index: {}]   ;;  %s7364_s11 = inlined_call_operand.vmem [shape: f32[40,82], index: 11, kind: input, shape index: {}]   ;;  %s7365_s12 = inlined_call_operand.vmem [shape: f32[1,82], index: 12, kind: input, shape index: {}]   ;;  %s7366_s13 = inlined_call_operand.vmem [shape: f32[82,256], index: 13, kind: input, shape index: {}]   ;;  %s7367_s14 = inlined_call_operand.vmem [shape: f32[1,256], index: 14, kind: input, shape index: {}]   ;;  %s7368_s15 = inlined_call_operand.vmem [shape: f32[2,256], index: 15, kind: output, shape index: {0}]   ;;  %s7369_s16 = inlined_call_operand.hbm [shape: f32[2,4], index: 16, kind: output, shape index: {1}]  }
   0x1   :  { %7437 = sst [smem:[#allocation20_spill]] %s7353_s0 }
   0x2   :  { %v70_v0 = vld [vmem:[%s7354_s1 + $0x80] sm:$0xff]  ;;  %v71_v1 = vld [vmem:[%s7354_s1 + $0x88] sm:$0xff]  ;;  %v72_v7 = vld [vmem:[%s7354_s1 + $0x90] sm:$0xff] }
   0x3   :  { %v54_v2 = vld [vmem:[%s7354_s1] sm:$0xff]  ;;  %v153_v3 = vand.u32 4294901760, %v70_v0  ;;  %v156_v4 = vand.u32 4294901760, %v71_v1  ;;  %v55_v5 = vld [vmem:[%s7354_s1 + $0x8] sm:$0xff]  ;;  %v73_v8 = vld [vmem:[%s7354_s1 + $0x98] sm:$0xff]  ;;  %v159_v10 = vand.u32 4294901760, %v72_v7 }
   0x4   :  { %v105_v6 = vand.u32 4294901760, %v54_v2  ;;  %v108_v9 = vand.u32 4294901760, %v55_v5  ;;  %v162_v11 = vand.u32 4294901760, %v73_v8  ;;  %v56_v12 = vld [vmem:[%s7354_s1 + $0x10] sm:$0xff]  ;;  %v57_v13 = vld [vmem:[%s7354_s1 + $0x18] sm:$0xff]  ;;  %v74_v14 = vld [vmem:[%s7354_s1 + $0xa0] sm:$0xff] }
   0x5   :  { %v5990_v15 = vpack.c.bf16 %v156_v4, %v153_v3  ;;  %v75_v16 = vld [vmem:[%s7354_s1 + $0xa8] sm:$0xff]  ;;  %v58_v17 = vld [vmem:[%s7354_s1 + $0x20] sm:$0xff]  ;;  %v6001_v19 = vsub.f32 %v70_v0, %v153_v3  ;;  %v76_v22 = vld [vmem:[%s7354_s1 + $0xb0] sm:$0xff]  ;;  %v6011_v23 = vsub.f32 %v71_v1, %v156_v4  ;;  %v111_v24 = vand.u32 4294901760, %v56_v12 }
   0x6   :  { %v59_v18 = vld [vmem:[%s7354_s1 + $0x28] sm:$0xff]  ;;  %v6003_v20 = vpack.c.bf16 %v108_v9, %v105_v6  ;;  %v6005_v21 = vpack.c.bf16 %v162_v11, %v159_v10  ;;  %v114_v25 = vand.u32 4294901760, %v57_v13  ;;  %v165_v26 = vand.u32 4294901760, %v74_v14  ;;  %v77_v31 = vld [vmem:[%s7354_s1 + $0xb8] sm:$0xff]  ;;  %v60_v32 = vld [vmem:[%s7354_s1 + $0x30] sm:$0xff] }
   0x7   :  { %5241 = vmatprep.subr.bf16.mxu0 %v5990_v15  ;;  %5337 = vmatprep.subr.bf16.mxu1 %v5990_v15  ;;  %v6015_v27 = vsub.f32 %v54_v2, %v105_v6  ;;  %v168_v28 = vand.u32 4294901760, %v75_v16  ;;  %v117_v29 = vand.u32 4294901760, %v58_v17  ;;  %v120_v30 = vand.u32 4294901760, %v59_v18  ;;  %v61_v37 = vld [vmem:[%s7354_s1 + $0x38] sm:$0xff]  ;;  %v78_v38 = vld [vmem:[%s7354_s1 + $0xc0] sm:$0xff]  ;;  %v79_v39 = vld [vmem:[%s7354_s1 + $0xc8] sm:$0xff] }
   0x8   :  { %5243 = vmatpush3.bf16.msra.mxu0 %v6003_v20  ;;  %5339 = vmatpush3.bf16.msra.mxu1 %v6003_v20  ;;  %v6024_v33 = vsub.f32 %v55_v5, %v108_v9  ;;  %v6027_v34 = vsub.f32 %v72_v7, %v159_v10  ;;  %v6029_v35 = vpack.c.bf16 %v114_v25, %v111_v24  ;;  %v171_v36 = vand.u32 4294901760, %v76_v22  ;;  %v62_v48 = vld [vmem:[%s7354_s1 + $0x40] sm:$0xff]  ;;  %v63_v49 = vld [vmem:[%s7354_s1 + $0x48] sm:$0xff]  ;;  %v80_v54 = vld [vmem:[%s7354_s1 + $0xd0] sm:$0xff] }
   0x9   :  { %7438 = vst [vmem:[#allocation5_spill] sm:$0xff] %v6015_v27  ;;  %5245 = vmatprep.subr.bf16.mxu0 %v6005_v21  ;;  %v6040_v40 = vsub.f32 %v73_v8, %v162_v11  ;;  %v6042_v41 = vsub.f32 %v56_v12, %v111_v24  ;;  %v6044_v42 = vsub.f32 %v57_v13, %v114_v25  ;;  %v174_v46 = vand.u32 4294901760, %v77_v31  ;;  %v81_v58 = vld [vmem:[%s7354_s1 + $0xd8] sm:$0xff]  ;;  %v64_v59 = vld [vmem:[%s7354_s1 + $0x50] sm:$0xff]  ;;  %v82_v1 = vld [vmem:[%s7354_s1 + $0xe0] sm:$0xff] }
   0xa   :  { %7439 = vst [vmem:[#allocation6_spill] sm:$0xff] %v6024_v33  ;;  %7440 = vst [vmem:[#allocation7_spill] sm:$0xff] %v6027_v34  ;;  %v6046_v43 = vpack.c.bf16 %v168_v28, %v165_v26  ;;  %5341 = vmatprep.subr.bf16.mxu1 %v6005_v21  ;;  %v6049_v44 = vsub.f32 %v74_v14, %v165_v26  ;;  %v6051_v45 = vsub.f32 %v75_v16, %v168_v28  ;;  %v65_v60 = vld [vmem:[%s7354_s1 + $0x58] sm:$0xff]  ;;  %v83_v2 = vld [vmem:[%s7354_s1 + $0xe8] sm:$0xff] }
   0xb   :  { %v123_v47 = vand.u32 4294901760, %v60_v32  ;;  %v6060_v50 = vpack.c.bf16 %v120_v30, %v117_v29  ;;  %v126_v51 = vand.u32 4294901760, %v61_v37  ;;  %v177_v52 = vand.u32 4294901760, %v78_v38 }
   0xc   :  { %5247 = vmatpush3.bf16.msra.mxu0 %v6029_v35  ;;  %v180_v53 = vand.u32 4294901760, %v79_v39  ;;  %5343 = vmatpush3.bf16.msra.mxu1 %v6029_v35  ;;  %v6067_v55 = vsub.f32 %v58_v17, %v117_v29  ;;  %v6069_v56 = vsub.f32 %v59_v18, %v120_v30  ;;  %v6071_v57 = vpack.c.bf16 %v174_v46, %v171_v36 }
   0xd   :  { %5249 = vmatprep.subr.bf16.mxu0 %v6046_v43  ;;  %5345 = vmatprep.subr.bf16.mxu1 %v6046_v43  ;;  %v6083_v61 = vsub.f32 %v76_v22, %v171_v36  ;;  %v6085_v62 = vsub.f32 %v77_v31, %v174_v46  ;;  %v129_v63 = vand.u32 4294901760, %v62_v48  ;;  %v132_v0 = vand.u32 4294901760, %v63_v49 }
   0xe   :  { %22 = vsyncpa [#allocation3], 0  ;;  %v6093_v3 = vpack.c.bf16 %v126_v51, %v123_v47  ;;  %v6095_v4 = vsub.f32 %v60_v32, %v123_v47  ;;  %v6097_v5 = vsub.f32 %v61_v37, %v126_v51  ;;  %v6099_v6 = vpack.c.bf16 %v180_v53, %v177_v52  ;;  %v66_v7 = vld [vmem:[%s7354_s1 + $0x60] sm:$0xff]  ;;  %v67_v12 = vld [vmem:[%s7354_s1 + $0x68] sm:$0xff]  ;;  %s7443_s23 = sld [smem:[#allocation20_spill]] }
   0xf   :  { %v183_v8 = vand.u32 4294901760, %v80_v54  ;;  %v186_v9 = vand.u32 4294901760, %v81_v58  ;;  %v135_v10 = vand.u32 4294901760, %v64_v59  ;;  %v138_v11 = vand.u32 4294901760, %v65_v60  ;;  %v84_v26 = vld [vmem:[%s7354_s1 + $0xf0] sm:$0xff]  ;;  %v6127_v28 = vld [vmem:[%s7354_s1 + $0xf8] sm:$0xff] }
  0x10   :  { %5251 = vmatpush3.bf16.msra.mxu0 %v6060_v50  ;;  %5347 = vmatpush3.bf16.msra.mxu1 %v6060_v50  ;;  %v6110_v13 = vsub.f32 %v78_v38, %v177_v52  ;;  %v6112_v14 = vsub.f32 %v79_v39, %v180_v53  ;;  %v189_v16 = vand.u32 4294901760, %v82_v1  ;;  %v192_v17 = vand.u32 4294901760, %v83_v2  ;;  %v6150_v47 = vld [vmem:[%s7354_s1 + $0x70] sm:$0xff]  ;;  %v6161_v53 = vld [vmem:[%s7354_s1 + $0x78] sm:$0xff] }
  0x11   :  { %5253 = vmatprep.subr.bf16.mxu0 %v6071_v57  ;;  %5349 = vmatprep.subr.bf16.mxu1 %v6071_v57  ;;  %v6115_v18 = vpack.c.bf16 %v132_v0, %v129_v63  ;;  %v6117_v22 = vsub.f32 %v62_v48, %v129_v63  ;;  %v6119_v24 = vsub.f32 %v63_v49, %v132_v0  ;;  %v141_v25 = vand.u32 4294901760, %v66_v7 }
  0x12   :  { %v6129_v29 = vpack.c.bf16 %v186_v9, %v183_v8  ;;  %v6131_v30 = vsub.f32 %v80_v54, %v183_v8  ;;  %v6133_v31 = vsub.f32 %v81_v58, %v186_v9  ;;  %v144_v32 = vand.u32 4294901760, %v67_v12 }
  0x13   :  { %7441 = vst [vmem:[#allocation8_spill] sm:$0xff] %v6115_v18  ;;  %v6139_v37 = vpack.c.bf16 %v138_v11, %v135_v10  ;;  %v6141_v38 = vsub.f32 %v64_v59, %v135_v10  ;;  %v6143_v39 = vsub.f32 %v65_v60, %v138_v11  ;;  %v6145_v46 = vpack.c.bf16 %v192_v17, %v189_v16 }
  0x14   :  { %7442 = vst [vmem:[#allocation9_spill] sm:$0xff] %v6129_v29  ;;  %v4399_v36 = vld.sshfl [vmem:[%s7443_s23] sm:$0x33 pattern:$0x76325410]  ;;  %5255 = vmatpush3.bf16.msra.mxu0 %v6093_v3  ;;  %v6153_v48 = vsub.f32 %v82_v1, %v189_v16  ;;  %v6155_v49 = vsub.f32 %v83_v2, %v192_v17  ;;  %v195_v51 = vand.u32 4294901760, %v84_v26  ;;  %5351 = vmatpush3.bf16.msra.mxu1 %v6093_v3 }
  0x15   :  { %7444 = vst [vmem:[#allocation10_spill] sm:$0xff] %v6139_v37  ;;  %7445 = vst [vmem:[#allocation11_spill] sm:$0xff] %v6145_v46  ;;  %5257 = vmatprep.subr.bf16.mxu0 %v6099_v6  ;;  %v7370_v52 = vand.u32 4294901760, %v6127_v28  ;;  %v101_v54 = vcombine.high %v4399_v36, %v4399_v36  ;;  %v6164_v58 = vand.u32 4294901760, %v4399_v36  ;;  %v7371_v59 = vand.u32 4294901760, %v6001_v19  ;;  %5353 = vmatprep.subr.bf16.mxu1 %v6099_v6 }
  0x16   :  { %v7372_v60 = vand.u32 4294901760, %v6011_v23  ;;  %v6169_v63 = vpack.c.bf16 %v144_v32, %v141_v25  ;;  %v6171_v0 = vsub.f32 %v66_v7, %v141_v25  ;;  %v6173_v1 = vsub.f32 %v67_v12, %v144_v32 }
  0x17   :  { %7446 = vst [vmem:[#allocation12_spill] sm:$0xff] %v6164_v58  ;;  %v6179_v8 = vpack.c.bf16 %v7370_v52, %v195_v51  ;;  %v6182_v10 = vand.u32 4294901760, %v101_v54  ;;  %v6185_v11 = vsub.f32 %v4399_v36, %v6164_v58  ;;  %v332_v7 = vsub.f32 %v6001_v19, %v7371_v59 }
  0x18   :  { %7447 = vst [vmem:[#allocation13_spill] sm:$0xff] %v6169_v63  ;;  %5259 = vmatpush3.bf16.msra.mxu0 %v6115_v18  ;;  %v339_v12 = vsub.f32 %v6011_v23, %v7372_v60  ;;  %v7373_v16 = vand.u32 4294901760, %v6015_v27  ;;  %v7376_v17 = vand.u32 4294901760, %v6024_v33  ;;  %5355 = vmatpush3.bf16.msra.mxu1 %v6115_v18  ;;  %v7382_v36 = vand.u32 4294901760, %v6027_v34 }
  0x19   :  { %7448 = vst [vmem:[#allocation14_spill] sm:$0xff] %v6179_v8  ;;  %7449 = vst [vmem:[#allocation15_spill] sm:$0xff] %v6182_v10  ;;  %5261 = vmatprep.subr.bf16.mxu0 %v6129_v29  ;;  %v6198_v25 = vsub.f32 %v101_v54, %v6182_v10  ;;  %v7381_v32 = vand.u32 4294901760, %v6185_v11  ;;  %5357 = vmatprep.subr.bf16.mxu1 %v6129_v29  ;;  %v333_v59 = vand.u32 4294901760, %v332_v7  ;;  %v7455_v29 = vand.u32 4294901760, %v6161_v53 }
  0x1a   :  { %7450 = vst [vmem:[#allocation16_spill] sm:$0xff] %v6185_v11  ;;  %v340_v9 = vand.u32 4294901760, %v339_v12  ;;  %v220_v60 = vsub.f32 %v6015_v27, %v7373_v16  ;;  %v227_v2 = vsub.f32 %v6024_v33, %v7376_v17  ;;  %v346_v7 = vsub.f32 %v6027_v34, %v7382_v36 }
  0x1b   :  { %7451 = vst [vmem:[#allocation17_spill] sm:$0xff] %v6198_v25  ;;  %v202_v54 = vand.u32 4294901760, %v6198_v25  ;;  %v209_v52 = vsub.f32 %v6185_v11, %v7381_v32  ;;  %v7452_v12 = vand.u32 4294901760, %v6040_v40  ;;  %v6222_v58 = vsub.f32 %v84_v26, %v195_v51 }
  0x1c   :  { %5263 = vmatpush3.bf16.msra.mxu0 %v6139_v37  ;;  %v7454_v17 = vand.u32 4294901760, %v6150_v47  ;;  %v5272_v33 = vpack.c.bf16 %v340_v9, %v333_v59  ;;  %v7387_v32 = vand.u32 4294901760, %v6042_v41  ;;  %5359 = vmatpush3.bf16.msra.mxu1 %v6139_v37  ;;  %v221_v27 = vand.u32 4294901760, %v220_v60 }
  0x1d   :  { %v353_v16 = vsub.f32 %v6040_v40, %v7452_v12  ;;  %5265 = vmatprep.subr.bf16.mxu0 %v6145_v46  ;;  %7453 = vst [vmem:[#allocation18_spill] sm:$0xff] %v6222_v58  ;;  %v203_v36 = vsub.f32 %v6198_v25, %v202_v54  ;;  %v210_v34 = vand.u32 4294901760, %v209_v52  ;;  %v228_v12 = vand.u32 4294901760, %v227_v2  ;;  %5361 = vmatprep.subr.bf16.mxu1 %v6145_v46 }
  0x1e   :  { %v6228_v18 = vpack.c.bf16 %v7455_v29, %v7454_v17  ;;  %685 = vmatprep.mubr.f32.mxu1 %v202_v54  ;;  %v347_v26 = vand.u32 4294901760, %v346_v7  ;;  %v234_v51 = vsub.f32 %v6042_v41, %v7387_v32  ;;  %v7388_v29 = vand.u32 4294901760, %v6044_v42 }
  0x1f   :  { %v7389_v59 = vand.u32 4294901760, %v6049_v44  ;;  %v204_v9 = vand.u32 4294901760, %v203_v36  ;;  %v354_v17 = vand.u32 4294901760, %v353_v16  ;;  %v7392_v52 = vand.u32 4294901760, %v6051_v45 }
  0x20   :  { %5267 = vmatpush3.bf16.msra.mxu0 %v6169_v63  ;;  %v7394_v60 = vand.u32 4294901760, %v6067_v55  ;;  %v235_v2 = vand.u32 4294901760, %v234_v51  ;;  %v241_v54 = vsub.f32 %v6044_v42, %v7388_v29  ;;  %v7396_v32 = vand.u32 4294901760, %v6069_v56  ;;  %5363 = vmatpush3.bf16.msra.mxu1 %v6169_v63 }
  0x21   :  { %5269 = vmatprep.subr.bf16.mxu0 %v6179_v8  ;;  %v360_v7 = vsub.f32 %v6049_v44, %v7389_v59  ;;  %205 = vmatprep.mubr.f32.mxu0 %v204_v9  ;;  %v367_v16 = vsub.f32 %v6051_v45, %v7392_v52  ;;  %v7398_v51 = vand.u32 4294901760, %v6083_v61  ;;  %v7399_v29 = vand.u32 4294901760, %v6085_v62 }
  0x22   :  { %v248_v36 = vsub.f32 %v6067_v55, %v7394_v60  ;;  %5365 = vmatprep.subr.bf16.mxu1 %v6179_v8  ;;  %v242_v59 = vand.u32 4294901760, %v241_v54  ;;  %v255_v9 = vsub.f32 %v6069_v56, %v7396_v32  ;;  %v7405_v63 = vand.u32 4294901760, %v6095_v4 }
  0x23   :  { %v361_v25 = vand.u32 4294901760, %v360_v7  ;;  %v5274_v52 = vpack.c.bf16 %v228_v12, %v221_v27  ;;  %v368_v46 = vand.u32 4294901760, %v367_v16  ;;  %v374_v60 = vsub.f32 %v6083_v61, %v7398_v51 }
  0x24   :  { %5271 = vmatpush3.bf16.msra.mxu0 %v6228_v18  ;;  %v381_v8 = vsub.f32 %v6085_v62, %v7399_v29  ;;  %v5276_v54 = vpack.c.bf16 %v354_v17, %v347_v26  ;;  %v249_v7 = vand.u32 4294901760, %v248_v36  ;;  %v262_v32 = vsub.f32 %v6095_v4, %v7405_v63  ;;  %5367 = vmatpush3.bf16.msra.mxu1 %v6228_v18 }
  0x25   :  { %5273 = vmatprep.subr.bf16.mxu0 %v5272_v33  ;;  %v7404_v37 = vand.u32 4294901760, %v6097_v5  ;;  %v5278_v27 = vpack.c.bf16 %v242_v59, %v235_v2  ;;  %v5280_v12 = vpack.c.bf16 %v368_v46, %v361_v25  ;;  %v256_v16 = vand.u32 4294901760, %v255_v9  ;;  %5401 = vmatprep.subr.bf16.mxu1 %v5990_v15 }
  0x26   :  { %v7403_v51 = vand.u32 4294901760, %v6110_v13  ;;  %v375_v29 = vand.u32 4294901760, %v374_v60  ;;  %v382_v33 = vand.u32 4294901760, %v381_v8  ;;  %v7400_v17 = vand.u32 4294901760, %v6112_v14 }
  0x27   :  { %211 = vmatmul.mubr.f32.vlgmr.msra.gmra.mrb[0].mxu0 %v210_v34  ;;  %v269_v26 = vsub.f32 %v6097_v5, %v7404_v37  ;;  %v263_v36 = vand.u32 4294901760, %v262_v32  ;;  %v7402_v25 = vand.u32 4294901760, %v6117_v22  ;;  %v7401_v59 = vand.u32 4294901760, %v6119_v24 }
  0x28   :  { %5275 = vmatpush3.bf16.msra.mxu0 %v5274_v52  ;;  %v388_v46 = vsub.f32 %v6110_v13, %v7403_v51  ;;  %441 = vmatprep.mubr.f32.mxu0 %v6182_v10  ;;  %v395_v34 = vsub.f32 %v6112_v14, %v7400_v17  ;;  %v7406_v8 = vand.u32 4294901760, %v6131_v30  ;;  %v7408_v32 = vand.u32 4294901760, %v6133_v31 }
  0x29   :  { %5277 = vmatprep.subr.bf16.mxu0 %v5276_v54  ;;  %v270_v15 = vand.u32 4294901760, %v269_v26  ;;  %v7456_v52 = vand.u32 4294901760, %v6185_v11  ;;  %v7457_v60 = vand.u32 4294901760, %v6127_v28  ;;  %v276_v9 = vsub.f32 %v6117_v22, %v7402_v25 }
  0x2a   :  { %v283_v54 = vsub.f32 %v6119_v24, %v7401_v59  ;;  %v402_v59 = vsub.f32 %v6131_v30, %v7406_v8  ;;  %v5282_v25 = vpack.c.bf16 %v256_v16, %v249_v7  ;;  %v5284_v51 = vpack.c.bf16 %v382_v33, %v375_v29 }
  0x2b   :  { %689 = vmatmul.mubr.f32.vlgmr.msra.gmra.mrb[0].mxu1 %v7456_v52  ;;  %v6298_v2 = vsub.f32 %v6127_v28, %v7457_v60  ;;  %v7459_v52 = vand.u32 4294901760, %v6150_v47  ;;  %v7460_v28 = vand.u32 4294901760, %v6161_v53  ;;  %v5286_v37 = vpack.c.bf16 %v270_v15, %v263_v36 }
  0x2c   :  { %5403 = vmatpush3.bf16.msra.mxu1 %v6003_v20  ;;  %959 = vmatprep.mubr.f32.mxu1 %v6182_v10  ;;  %v409_v20 = vsub.f32 %v6133_v31, %v7408_v32  ;;  %v7409_v63 = vand.u32 4294901760, %v6153_v48  ;;  %v284_v26 = vand.u32 4294901760, %v283_v54  ;;  %v403_v8 = vand.u32 4294901760, %v402_v59 }
  0x2d   :  { %7458 = vst [vmem:[#allocation19_spill] sm:$0xff] %v6298_v2  ;;  %v6312_v17 = vsub.f32 %v6150_v47, %v7459_v52  ;;  %v6317_v60 = vsub.f32 %v6161_v53, %v7460_v28  ;;  %5405 = vmatprep.subr.bf16.mxu1 %v6005_v21  ;;  %5279 = vmatpush3.bf16.msra.mxu0 %v5278_v27  ;;  %v389_v47 = vand.u32 4294901760, %v388_v46  ;;  %v7410_v52 = vand.u32 4294901760, %v6143_v39 }
  0x2e   :  { %5281 = vmatprep.subr.bf16.mxu0 %v5280_v12  ;;  %v396_v53 = vand.u32 4294901760, %v395_v34  ;;  %v277_v28 = vand.u32 4294901760, %v276_v9  ;;  %v7461_v10 = vand.u32 4294901760, %v6141_v38  ;;  %v422_v21 = vand.u32 4294901760, %v6155_v49 }
  0x2f   :  { %v410_v29 = vand.u32 4294901760, %v409_v20  ;;  %v297_v7 = vsub.f32 %v6143_v39, %v7410_v52  ;;  %v303_v27 = vand.u32 4294901760, %v6171_v0  ;;  %v310_v12 = vand.u32 4294901760, %v6173_v1 }
  0x30   :  { %v290_v32 = vsub.f32 %v6141_v38, %v7461_v10  ;;  %5407 = vmatpush3.bf16.msra.mxu1 %v6029_v35  ;;  %v416_v10 = vsub.f32 %v6153_v48, %v7409_v63  ;;  %v423_v16 = vsub.f32 %v6155_v49, %v422_v21  ;;  %v429_v35 = vand.u32 4294901760, %v6222_v58 }
  0x31   :  { %5409 = vmatprep.subr.bf16.mxu1 %v6046_v43  ;;  %5283 = vmatpush3.bf16.msra.mxu0 %v5282_v25  ;;  %v436_v33 = vand.u32 4294901760, %v6298_v2  ;;  %v5288_v36 = vpack.c.bf16 %v396_v53, %v389_v47  ;;  %v304_v46 = vsub.f32 %v6171_v0, %v303_v27  ;;  %v311_v59 = vsub.f32 %v6173_v1, %v310_v12 }
  0x32   :  { %5285 = vmatprep.subr.bf16.mxu0 %v5284_v51  ;;  %v317_v15 = vand.u32 4294901760, %v6312_v17  ;;  %v430_v43 = vsub.f32 %v6222_v58, %v429_v35  ;;  %v5290_v34 = vpack.c.bf16 %v284_v26, %v277_v28  ;;  %v5292_v9 = vpack.c.bf16 %v410_v29, %v403_v8 }
  0x33   :  { %v437_v25 = vsub.f32 %v6298_v2, %v436_v33  ;;  %v291_v54 = vand.u32 4294901760, %v290_v32  ;;  %v324_v20 = vand.u32 4294901760, %v6317_v60  ;;  %v298_v51 = vand.u32 4294901760, %v297_v7 }
  0x34   :  { %5411 = vmatpush3.bf16.msra.mxu1 %v6060_v50  ;;  %v417_v47 = vand.u32 4294901760, %v416_v10  ;;  %v424_v53 = vand.u32 4294901760, %v423_v16  ;;  %v305_v63 = vand.u32 4294901760, %v304_v46  ;;  %v312_v52 = vand.u32 4294901760, %v311_v59  ;;  %v7464_v16 = vld [vmem:[#allocation5_spill] sm:$0xff]  ;;  %v7466_v46 = vld [vmem:[#allocation6_spill] sm:$0xff] }
  0x35   :  { %5413 = vmatprep.subr.bf16.mxu1 %v6071_v57  ;;  %5287 = vmatpush3.bf16.msra.mxu0 %v5286_v37  ;;  %v431_v11 = vand.u32 4294901760, %v430_v43  ;;  %v438_v58 = vand.u32 4294901760, %v437_v25  ;;  %v318_v2 = vsub.f32 %v6312_v17, %v317_v15  ;;  %v325_v50 = vsub.f32 %v6317_v60, %v324_v20 }
  0x36   :  { %5289 = vmatprep.subr.bf16.mxu0 %v5288_v36  ;;  %v5294_v8 = vpack.c.bf16 %v298_v51, %v291_v54  ;;  %v5296_v57 = vpack.c.bf16 %v424_v53, %v417_v47  ;;  %v5298_v37 = vpack.c.bf16 %v312_v52, %v305_v63  ;;  %v7462_v29 = vand.u32 4294901760, %v6001_v19 }
  0x37   :  { %v5300_v32 = vpack.c.bf16 %v438_v58, %v431_v11  ;;  %v319_v26 = vand.u32 4294901760, %v318_v2  ;;  %v326_v28 = vand.u32 4294901760, %v325_v50  ;;  %v7463_v7 = vand.u32 4294901760, %v6011_v23  ;;  %v7471_v58 = vld [vmem:[#allocation8_spill] sm:$0xff] }
  0x38   :  { %5415 = vmatpush3.bf16.msra.mxu1 %v6093_v3  ;;  %v7465_v36 = vand.u32 4294901760, %v7464_v16  ;;  %v7467_v3 = vand.u32 4294901760, %v7466_v46  ;;  %v7470_v25 = vand.u32 4294901760, %v6040_v40  ;;  %v7472_v11 = vand.u32 4294901760, %v6042_v41 }
  0x39   :  { %5417 = vmatprep.subr.bf16.mxu1 %v6099_v6  ;;  %5291 = vmatpush3.bf16.msra.mxu0 %v5290_v34  ;;  %v6361_v10 = vpack.c.bf16 %v7463_v7, %v7462_v29  ;;  %v7468_v6 = vld [vmem:[#allocation7_spill] sm:$0xff]  ;;  %v7473_v2 = vand.u32 4294901760, %v6044_v42  ;;  %v7474_v34 = vand.u32 4294901760, %v6049_v44  ;;  %v7477_v51 = vand.u32 4294901760, %v6067_v55 }
  0x3a   :  { %5293 = vmatprep.subr.bf16.mxu0 %v5292_v9  ;;  %v6367_v59 = vpack.c.bf16 %v7467_v3, %v7465_v36  ;;  %v7469_v43 = vand.u32 4294901760, %v7468_v6  ;;  %v7475_v9 = vand.u32 4294901760, %v6051_v45  ;;  %v7478_v47 = vand.u32 4294901760, %v6069_v56  ;;  %v7483_v36 = vld [vmem:[#allocation9_spill] sm:$0xff] }
  0x3b   :  { %v6380_v52 = vpack.c.bf16 %v7473_v2, %v7472_v11  ;;  %v7480_v50 = vand.u32 4294901760, %v6083_v61  ;;  %v7481_v29 = vand.u32 4294901760, %v6085_v62  ;;  %v7484_v3 = vand.u32 4294901760, %v6095_v4 }
  0x3c   :  { %v6373_v63 = vpack.c.bf16 %v7470_v25, %v7469_v43  ;;  %5419 = vmatpush3.bf16.msra.mxu1 %v7471_v58  ;;  %v6386_v54 = vpack.c.bf16 %v7475_v9, %v7474_v34  ;;  %v6392_v53 = vpack.c.bf16 %v7478_v47, %v7477_v51  ;;  %v7485_v43 = vand.u32 4294901760, %v6097_v5 }
  0x3d   :  { %v6398_v7 = vpack.c.bf16 %v7481_v29, %v7480_v50  ;;  %5421 = vmatprep.subr.bf16.mxu1 %v7483_v36  ;;  %5295 = vmatpush3.bf16.msra.mxu0 %v5294_v8  ;;  %v7486_v58 = vand.u32 4294901760, %v6110_v13  ;;  %v7487_v11 = vand.u32 4294901760, %v6112_v14  ;;  %v7488_v34 = vand.u32 4294901760, %v6117_v22 }
  0x3e   :  { %7476 = vst [vmem:[#allocation5_spill] sm:$0xff] %v6386_v54  ;;  %7479 = vst [vmem:[#allocation6_spill] sm:$0xff] %v6392_v53  ;;  %v5382_v25 = vpack.c.bf16 %v7485_v43, %v7484_v3  ;;  %v7489_v9 = vand.u32 4294901760, %v6119_v24  ;;  %v7490_v47 = vand.u32 4294901760, %v6131_v30  ;;  %v7491_v50 = vand.u32 4294901760, %v6133_v31  ;;  %5297 = vmatprep.subr.bf16.mxu0 %v5296_v57  ;;  %v7495_v53 = vld [vmem:[#allocation10_spill] sm:$0xff] }
  0x3f   :  { %7482 = vst [vmem:[#allocation7_spill] sm:$0xff] %v6398_v7  ;;  %v5384_v2 = vpack.c.bf16 %v7487_v11, %v7486_v58  ;;  %v7492_v29 = vand.u32 4294901760, %v6141_v38  ;;  %v7493_v36 = vand.u32 4294901760, %v6143_v39  ;;  %v7494_v43 = vand.u32 4294901760, %v6153_v48 }
  0x40   :  { %v5386_v51 = vpack.c.bf16 %v7489_v9, %v7488_v34  ;;  %v5388_v8 = vpack.c.bf16 %v7491_v50, %v7490_v47  ;;  %v5394_v58 = vpack.c.bf16 %v310_v12, %v303_v27  ;;  %v5396_v11 = vpack.c.bf16 %v436_v33, %v429_v35  ;;  %5423 = vmatpush3.bf16.msra.mxu1 %v7495_v53  ;;  %v7496_v34 = vld [vmem:[#allocation11_spill] sm:$0xff]  ;;  %v7497_v47 = vld [vmem:[#allocation13_spill] sm:$0xff]  ;;  %v7498_v50 = vld [vmem:[#allocation14_spill] sm:$0xff] }
  0x41   :  { %v5390_v3 = vpack.c.bf16 %v7493_v36, %v7492_v29  ;;  %v5392_v7 = vpack.c.bf16 %v422_v21, %v7494_v43  ;;  %v5398_v54 = vpack.c.bf16 %v324_v20, %v317_v15  ;;  %5425 = vmatprep.subr.bf16.mxu1 %v7496_v34  ;;  %5299 = vmatpush3.bf16.msra.mxu0 %v5298_v37  ;;  %v7499_v12 = vld [vmem:[#allocation12_spill] sm:$0xff]  ;;  %v969_v33 = vld [vmem:[%s7356_s3 + $0x10] sm:$0xff]  ;;  %vm989_vm0 = vcmask 1043456  }
  0x42   :  { %v5302_v9 = vpack.c.bf16 %v326_v28, %v319_v26  ;;  %5301 = vmatprep.subr.bf16.mxu0 %v5300_v32  ;;  %v5304_v57 = vpack.c.bf16 %v6011_v23, %v6001_v19  ;;  %v5306_v21 = vpack.c.bf16 %v7466_v46, %v7464_v16  ;;  %v5308_v27 = vpack.c.bf16 %v6040_v40, %v7468_v6  ;;  %v7500_v23 = vld [vmem:[#allocation17_spill] sm:$0xff]  ;;  %v970_v15 = vld [vmem:[%s7356_s3 + $0x18] sm:$0xff] }
  0x43   :  { %v5310_v19 = vpack.c.bf16 %v6044_v42, %v6042_v41  ;;  %v5312_v35 = vpack.c.bf16 %v6051_v45, %v6049_v44  ;;  %v5314_v40 = vpack.c.bf16 %v6069_v56, %v6067_v55  ;;  %v5318_v41 = vpack.c.bf16 %v6097_v5, %v6095_v4  ;;  %v7502_v4 = vld [vmem:[#allocation19_spill] sm:$0xff]  ;;  %v971_v26 = vld [vmem:[%s7356_s3 + $0x20] sm:$0xff]  ;;  %v972_v28 = vld [vmem:[%s7356_s3 + $0x28] sm:$0xff] }
  0x44   :  { %5427 = vmatpush3.bf16.msra.mxu1 %v7497_v47  ;;  %v5320_v42 = vpack.c.bf16 %v6112_v14, %v6110_v13  ;;  %v5322_v44 = vpack.c.bf16 %v6119_v24, %v6117_v22  ;;  %v5324_v45 = vpack.c.bf16 %v6133_v31, %v6131_v30  ;;  %v5326_v55 = vpack.c.bf16 %v6143_v39, %v6141_v38  ;;  %v7503_v14 = vld [vmem:[#allocation16_spill] sm:$0xff]  ;;  %v7504_v22 = vld [vmem:[#allocation15_spill] sm:$0xff]  ;;  %v968_v39 = vld [vmem:[%s7356_s3 + $0x8] sm:$0xff] }
  0x45   :  { %5429 = vmatprep.subr.bf16.mxu1 %v7498_v50  ;;  %5303 = vmatpush3.bf16.msra.mxu0 %v5302_v9  ;;  %v5328_v56 = vpack.c.bf16 %v6155_v49, %v6153_v48  ;;  %v5334_v13 = vpack.c.bf16 %v6317_v60, %v6312_v17  ;;  %v7505_v24 = vld [vmem:[#allocation5_spill] sm:$0xff]  ;;  %v7506_v30 = vld [vmem:[#allocation6_spill] sm:$0xff]  ;;  %v5874_v48 = vmov 0.0|0.0   ;;  %v1000_v20 = vand.u32 4294901760, %v969_v33  ;;  %v974_v6 = vld [vmem:[%s7356_s3 + $0x38] sm:$0xff] }
  0x46   :  { %5305 = vmatprep.subr.bf16.mxu0 %v5304_v57  ;;  %v7507_v31 = vld [vmem:[#allocation7_spill] sm:$0xff]  ;;  %v967_v38 = vld [vmem:[%s7356_s3] sm:$0xff]  ;;  %v1003_v37 = vand.u32 4294901760, %v970_v15  ;;  %v1009_v16 = vand.u32 4294901760, %v972_v28  ;;  %vm5875_vm1 = vmmov 0   ;;  %v7434_v47 = vmov 0.0  }
  0x47   :  { %v994_v49 = vand.u32 4294901760, %v967_v38  ;;  %v975_v53 = vld [vmem:[%s7356_s3 + $0x40] sm:$0xff]  ;;  %vm985_vm2 = vcmask 687104   ;;  %vm1582_vm3 = vcmask 326656   ;;  %vm2618_vm4 = vcmask 130048  }
  0x48   :  { %5431 = vmatpush3.bf16.msra.mxu1 %v6228_v18  ;;  %443 = vmatmul.mubr.f32.vlgmr.msra.gmra.mrb[2].mxu0 %v7499_v12  ;;  %v5316_v18 = vpack.c.bf16 %v6085_v62, %v6083_v61  ;;  %v5330_v61 = vpack.c.bf16 %v6173_v1, %v6171_v0  ;;  %v7501_v62 = vld [vmem:[#allocation18_spill] sm:$0xff]  ;;  %v997_v0 = vand.u32 4294901760, %v968_v39  ;;  %v6495_v32 = vpack.c.bf16 %v1003_v37, %v1000_v20 }
  0x49   :  { %5307 = vmatpush3.bf16.msra.mxu0 %v5306_v21  ;;  %578 = vmatprep.mubr.f32.mxu0 %v7500_v23  ;;  %v5332_v5 = vpack.c.bf16 %v7502_v4, %v7501_v62  ;;  %v6483_v17 = vsub.f32 %v967_v38, %v994_v49  ;;  %v6531_v36 = vsub.f32 %v972_v28, %v1009_v16  ;;  %vm2595_vm5 = vcmask 25600  }
  0x4a   :  { %5309 = vmatprep.subr.bf16.mxu0 %v5308_v27  ;;  %5528 = vmatprep.subr.bf16.mxu1 %v5874_v48  ;;  %v6481_v1 = vpack.c.bf16 %v997_v0, %v994_v49  ;;  %v6485_v60 = vsub.f32 %v968_v39, %v997_v0  ;;  %vm3634_vm6 = vcmask 1041408   ;;  %vm3630_vm7 = vcmask 670720  }
  0x4b   :  { %961 = vmatmul.mubr.f32.vlgmr.msra.gmra.mrb[2].mxu1 %v7499_v12  ;;  %v1082_v50 = vand.u32 4294901760, %v6483_v17 }
  0x4c   :  { %v1089_v21 = vand.u32 4294901760, %v6485_v60  ;;  %4987 = vmatprep.mubr.msk.f32.mxu1 %vm5875_vm1, %v7434_v47 }
  0x4d   :  { %5311 = vmatpush3.bf16.msra.mxu0 %v5310_v19 }
  0x4e   :  { %5313 = vmatprep.subr.bf16.mxu0 %v5312_v35  ;;  %v1090_v19 = vsub.f32 %v6485_v60, %v1089_v21 }
  0x51   :  { %5315 = vmatpush3.bf16.msra.mxu0 %v5314_v40 }
  0x52   :  { %5317 = vmatprep.subr.bf16.mxu0 %v5316_v18  ;;  %v1091_v18 = vand.u32 4294901760, %v1090_v19  ;;  %v4398_v19 = vld [vmem:[%s7355_s2] ss:$0 sm:$0xff] }
  0x55   :  { %5319 = vmatpush3.bf16.msra.mxu0 %v5318_v41 }
  0x56   :  { %5321 = vmatprep.subr.bf16.mxu0 %v5320_v42 }
  0x59   :  { %5323 = vmatpush3.bf16.msra.mxu0 %v5322_v44 }
  0x5a   :  { %5325 = vmatprep.subr.bf16.mxu0 %v5324_v45 }
  0x5d   :  { %5327 = vmatpush3.bf16.msra.mxu0 %v5326_v55 }
  0x5e   :  { %5329 = vmatprep.subr.bf16.mxu0 %v5328_v56 }
  0x61   :  { %5331 = vmatpush3.bf16.msra.mxu0 %v5330_v61  ;;  %v1117_v61 = vand.u32 4294901760, %v6531_v36 }
  0x62   :  { %5333 = vmatprep.subr.bf16.mxu0 %v5332_v5 }
  0x63   :  { %v1118_v5 = vsub.f32 %v6531_v36, %v1117_v61 }
  0x65   :  { %5335 = vmatpush3.bf16.msra.mxu0 %v5334_v13 }
  0x66   :  { %5369 = vmatprep.subr.bf16.mxu0 %v6361_v10  ;;  %v1006_v10 = vand.u32 4294901760, %v971_v26 }
  0x68   :  { %581 = vmatmul.mubr.f32.vlgmr.msra.gmra.mrb[4].mxu0 %v7503_v14  ;;  %v6505_v46 = vpack.c.bf16 %v1009_v16, %v1006_v10  ;;  %v6529_v29 = vsub.f32 %v971_v26, %v1006_v10 }
  0x69   :  { %5371 = vmatpush3.bf16.msra.mxu0 %v6367_v59  ;;  %855 = vmatprep.mubr.f32.mxu0 %v7504_v22  ;;  %v973_v59 = vld [vmem:[%s7356_s3 + $0x30] sm:$0xff] }
  0x6a   :  { %5373 = vmatprep.subr.bf16.mxu0 %v6373_v63  ;;  %v1012_v63 = vand.u32 4294901760, %v973_v59  ;;  %v1110_v56 = vand.u32 4294901760, %v6529_v29 }
  0x6c   :  { %v6536_v43 = vsub.f32 %v973_v59, %v1012_v63  ;;  %v1111_v4 = vsub.f32 %v6529_v29, %v1110_v56 }
  0x6d   :  { %5375 = vmatpush3.bf16.msra.mxu0 %v6380_v52  ;;  %v1015_v52 = vand.u32 4294901760, %v974_v6 }
  0x6e   :  { %5377 = vmatprep.subr.bf16.mxu0 %v7505_v24  ;;  %v1112_v13 = vand.u32 4294901760, %v1111_v4  ;;  %v1124_v14 = vand.u32 4294901760, %v6536_v43  ;;  %v1119_v24 = vand.u32 4294901760, %v1118_v5 }
  0x70   :  { %v5454_v38 = vpack.c.bf16 %v1119_v24, %v1112_v13 }
  0x71   :  { %5379 = vmatpush3.bf16.msra.mxu0 %v7506_v30  ;;  %v1125_v30 = vsub.f32 %v6536_v43, %v1124_v14 }
  0x72   :  { %5381 = vmatprep.subr.bf16.mxu0 %v7507_v31 }
  0x73   :  { %v1126_v39 = vand.u32 4294901760, %v1125_v30 }
  0x75   :  { %5383 = vmatpush3.bf16.msra.mxu0 %v5382_v25  ;;  %v1018_v25 = vand.u32 4294901760, %v975_v53 }
  0x76   :  { %5385 = vmatprep.subr.bf16.mxu0 %v5384_v2 }
  0x77   :  { %v6542_v34 = vsub.f32 %v975_v53, %v1018_v25 }
  0x79   :  { %5387 = vmatpush3.bf16.msra.mxu0 %v5386_v51  ;;  %v6525_v51 = vsub.f32 %v969_v33, %v1000_v20  ;;  %v1138_v0 = vand.u32 4294901760, %v6542_v34 }
  0x7a   :  { %5389 = vmatprep.subr.bf16.mxu0 %v5388_v8  ;;  %v6527_v8 = vsub.f32 %v970_v15, %v1003_v37 }
  0x7b   :  { %v1096_v23 = vand.u32 4294901760, %v6525_v51  ;;  %v1139_v37 = vsub.f32 %v6542_v34, %v1138_v0 }
  0x7c   :  { %v1103_v35 = vand.u32 4294901760, %v6527_v8 }
  0x7d   :  { %5391 = vmatpush3.bf16.msra.mxu0 %v5390_v3  ;;  %v977_v3 = vld [vmem:[%s7356_s3 + $0x50] sm:$0xf]  ;;  %v1097_v41 = vsub.f32 %v6525_v51, %v1096_v23  ;;  %v1140_v59 = vand.u32 4294901760, %v1139_v37 }
  0x7e   :  { %5393 = vmatprep.subr.bf16.mxu0 %v5392_v7  ;;  %v976_v7 = vld [vmem:[%s7356_s3 + $0x48] sm:$0xff]  ;;  %v6547_v57 = vsel %vm989_vm0, %v977_v3, 0  ;;  %v1104_v42 = vsub.f32 %v6527_v8, %v1103_v35 }
  0x7f   :  { %v1021_v2 = vand.u32 4294901760, %v976_v7  ;;  %v6555_v27 = vand.u32 4294901760, %v6547_v57  ;;  %v1098_v45 = vand.u32 4294901760, %v1097_v41 }
  0x80   :  { %v1105_v55 = vand.u32 4294901760, %v1104_v42 }
  0x81   :  { %5395 = vmatpush3.bf16.msra.mxu0 %v5394_v58  ;;  %v6538_v58 = vsub.f32 %v974_v6, %v1015_v52  ;;  %v6544_v9 = vsub.f32 %v976_v7, %v1021_v2  ;;  %v5463_v7 = vpack.c.bf16 %v6485_v60, %v6483_v17 }
  0x82   :  { %5397 = vmatprep.subr.bf16.mxu0 %v5396_v11  ;;  %v6540_v11 = vpack.c.bf16 %v1021_v2, %v1018_v25  ;;  %v6579_v62 = vpack.c.bf16 %v1105_v55, %v1098_v45  ;;  %v5466_v25 = vpack.c.bf16 %v6527_v8, %v6525_v51  ;;  %v5469_v2 = vpack.c.bf16 %v6531_v36, %v6529_v29  ;;  %v1572_v36 = vld [vmem:[%s7358_s5 + $0x10] sm:$0xff] }
  0x83   :  { %v1131_v22 = vand.u32 4294901760, %v6538_v58  ;;  %v1145_v33 = vand.u32 4294901760, %v6544_v9  ;;  %v5472_v3 = vpack.c.bf16 %v6538_v58, %v6536_v43  ;;  %v1573_v43 = vld [vmem:[%s7358_s5 + $0x18] sm:$0xff] }
  0x85   :  { %5399 = vmatpush3.bf16.msra.mxu0 %v5398_v54  ;;  %v6515_v54 = vpack.c.bf16 %v1015_v52, %v1012_v63  ;;  %v1132_v31 = vsub.f32 %v6538_v58, %v1131_v22  ;;  %v1146_v26 = vsub.f32 %v6544_v9, %v1145_v33  ;;  %v5502_v60 = vpack.c.bf16 %v1131_v22, %v1124_v14  ;;  %v1574_v22 = vld [vmem:[%s7358_s5 + $0x20] sm:$0xff] }
  0x86   :  { %5432 = vmatprep.subr.bf16.mxu0 %v5874_v48  ;;  %v5505_v51 = vpack.c.bf16 %v1145_v33, %v1138_v0  ;;  %v6715_v33 = vand.u32 4294901760, %v1574_v22 }
  0x87   :  { %v1133_v49 = vand.u32 4294901760, %v1132_v31  ;;  %v1147_v6 = vand.u32 4294901760, %v1146_v26 }
  0x88   :  { %857 = vmatmul.mubr.f32.vlgmr.msra.gmra.mrb[6].mxu0 %v7499_v12  ;;  %v1083_v12 = vsub.f32 %v6483_v17, %v1082_v50  ;;  %v5499_v17 = vpack.c.bf16 %v1117_v61, %v1110_v56 }
  0x89   :  { %5434 = vmatpush3.bf16.msra.mxu0 %v6481_v1  ;;  %4836 = vmatprep.mubr.msk.f32.mxu0 %vm5875_vm1, %v7434_v47  ;;  %v5457_v20 = vpack.c.bf16 %v1133_v49, %v1126_v39  ;;  %v5460_v53 = vpack.c.bf16 %v1147_v6, %v1140_v59 }
  0x8a   :  { %5435 = vmatprep.subr.bf16.mxu0 %v5874_v48  ;;  %v1084_v40 = vand.u32 4294901760, %v1083_v12  ;;  %v5475_v12 = vpack.c.bf16 %v6544_v9, %v6542_v34  ;;  %v1593_v34 = vand.u32 4294901760, %v1572_v36  ;;  %v1596_v9 = vand.u32 4294901760, %v1573_v43 }
  0x8c   :  { %v6575_v44 = vpack.c.bf16 %v1091_v18, %v1084_v40 }
  0x8d   :  { %5437 = vmatpush3.bf16.msra.mxu0 %v6495_v32 }
  0x8e   :  { %5438 = vmatprep.subr.bf16.mxu0 %v5874_v48 }
  0x91   :  { %5440 = vmatpush3.bf16.msra.mxu0 %v6505_v46 }
  0x92   :  { %5441 = vmatprep.subr.bf16.mxu0 %v5874_v48 }
  0x95   :  { %5443 = vmatpush3.bf16.msra.mxu0 %v6515_v54 }
  0x96   :  { %5444 = vmatprep.subr.bf16.mxu0 %v5874_v48 }
  0x99   :  { %5446 = vmatpush3.bf16.msra.mxu0 %v6540_v11 }
  0x9a   :  { %4834 = vmatprep.subr.mxu0 %v7434_v47 }
  0x9d   :  { %4835 = vmatpush3.msra.mxu0 %v6555_v27 }
  0x9e   :  { %5447 = vmatprep.subr.bf16.mxu0 %v5874_v48 }
  0xfa   :  { %v4438_v15 = vpop.f32.mrb[0].mxu0 }
  0xfb   :  { %v4439_v28 = vpop.f32.mrb[1].mxu0 }
  0xfc   :  { %v4440_v10 = vadd.f32 %v4439_v28, %v4438_v15 }
  0xfe   :  { %v4543_v16 = vpop.f32.mrb[0].mxu1  ;;  %v213_v41 = vadd.f32 %v4440_v10, %v4398_v19 }
  0xff   :  { %v4544_v63 = vpop.f32.mrb[1].mxu1 }
 0x100   :  { %v4545_v52 = vadd.f32 %v4544_v63, %v4543_v16 }
 0x11b   :  { %v4473_v40 = vpop.f32.mrb[2].mxu0 }
 0x11c   :  { %v4474_v18 = vpop.f32.mrb[3].mxu0 }
 0x11d   :  { %v4475_v42 = vadd.f32 %v4474_v18, %v4473_v40 }
 0x11e   :  { %v4613_v45 = vpop.f32.mrb[2].mxu1 }
 0x11f   :  { %v4614_v55 = vpop.f32.mrb[3].mxu1  ;;  %v445_v4 = vadd.f32 %v4475_v42, %v213_v41 }
 0x120   :  { %v4615_v5 = vadd.f32 %v4614_v55, %v4613_v45 }
 0x13b   :  { %v4508_v13 = vpop.f32.mrb[4].mxu0 }
 0x13c   :  { %v4509_v24 = vpop.f32.mrb[5].mxu0 }
 0x13d   :  { %v4510_v30 = vadd.f32 %v4509_v24, %v4508_v13 }
 0x13f   :  { %v583_v31 = vadd.f32 %v4510_v30, %v445_v4  ;;  %v5526_v4 = vpack.c.bf16 %v1596_v9, %v1593_v34  ;;  %v4400_v30 = vld [vmem:[%s7357_s4] ss:$0 sm:$0xff] }
 0x141   :  { %v691_v39 = vadd.f32 %v4545_v52, %v583_v31  ;;  %v1151_v52 = vsub.f32 %v6547_v57, %v6555_v27  ;;  %v5493_v57 = vpack.c.bf16 %v1089_v21, %v1082_v50 }
 0x143   :  { %v1152_v18 = vand.u32 4294901760, %v1151_v52 }
 0x145   :  { %v1153_v41 = vsub.f32 %v1151_v52, %v1152_v18 }
 0x15b   :  { %v4578_v49 = vpop.f32.mrb[6].mxu0 }
 0x15c   :  { %v4579_v15 = vpop.f32.mrb[7].mxu0 }
 0x15d   :  { %v4580_v37 = vadd.f32 %v4579_v15, %v4578_v49 }
 0x15f   :  { %v859_v26 = vadd.f32 %v4580_v37, %v691_v39 }
 0x161   :  { %v963_v28 = vadd.f32 %v4615_v5, %v859_v26 }
 0x163   :  { %v966_v16 = vmax.f32 %v963_v28, 0.0 }
 0x165   :  { %v987_v59 = vsel %vm985_vm2, %v966_v16, 0 }
 0x166   :  { %v6616_v6 = vand.u32 4294901760, %v987_v59 }
 0x168   :  { %v1070_v10 = vsub.f32 %v987_v59, %v6616_v6 }
 0x16a   :  { %v1071_v63 = vand.u32 4294901760, %v1070_v10 }
 0x16c   :  { %v1072_v19 = vsub.f32 %v1070_v10, %v1071_v63 }
 0x16e   :  { %v1073_v40 = vand.u32 4294901760, %v1072_v19 }
 0x170   :  { %4837 = vmatmul.mubr.f32.vlgmr.msra.gmra.mrb[8].mxu0 %v1073_v40 }
 0x171   :  { %5449 = vmatpush3.bf16.msra.mxu0 %v6575_v44  ;;  %4861 = vmatprep.mubr.msk.f32.mxu0 %vm5875_vm1, %v7434_v47  ;;  %v1154_v44 = vand.u32 4294901760, %v1153_v41  ;;  %v2088_v41 = vld [vmem:[%s7360_s7 + $0x18] sm:$0xff] }
 0x172   :  { %5450 = vmatprep.subr.bf16.mxu0 %v5874_v48 }
 0x175   :  { %5452 = vmatpush3.bf16.msra.mxu0 %v6579_v62  ;;  %v5496_v62 = vpack.c.bf16 %v1103_v35, %v1096_v23  ;;  %v1689_v23 = vsub.f32 %v1573_v43, %v1596_v9 }
 0x176   :  { %5453 = vmatprep.subr.bf16.mxu0 %v5874_v48 }
 0x177   :  { %v1690_v14 = vand.u32 4294901760, %v1689_v23 }
 0x179   :  { %5455 = vmatpush3.bf16.msra.mxu0 %v5454_v38 }
 0x17a   :  { %5456 = vmatprep.subr.bf16.mxu0 %v5874_v48 }
 0x17d   :  { %5458 = vmatpush3.bf16.msra.mxu0 %v5457_v20  ;;  %v1691_v20 = vsub.f32 %v1689_v23, %v1690_v14 }
 0x17e   :  { %5459 = vmatprep.subr.bf16.mxu0 %v5874_v48 }
 0x181   :  { %5461 = vmatpush3.bf16.msra.mxu0 %v5460_v53 }
 0x182   :  { %4859 = vmatprep.subr.mxu0 %v7434_v47 }
 0x185   :  { %4860 = vmatpush3.msra.mxu0 %v1154_v44 }
 0x186   :  { %4862 = vmatmul.mubr.f32.vlgmr.msra.gmra.mrb[8].mxu0 %v6616_v6  ;;  %5462 = vmatprep.subr.bf16.mxu0 %v5874_v48 }
 0x187   :  { %5464 = vmatpush3.bf16.msra.mxu0 %v5463_v7  ;;  %4886 = vmatprep.mubr.msk.f32.mxu0 %vm5875_vm1, %v7434_v47  ;;  %v6718_v7 = vsub.f32 %v1574_v22, %v6715_v33 }
 0x188   :  { %5465 = vmatprep.subr.bf16.mxu0 %v5874_v48 }
 0x18b   :  { %5467 = vmatpush3.bf16.msra.mxu0 %v5466_v25  ;;  %v1692_v25 = vand.u32 4294901760, %v1691_v20 }
 0x18c   :  { %5468 = vmatprep.subr.bf16.mxu0 %v5874_v48 }
 0x18f   :  { %5470 = vmatpush3.bf16.msra.mxu0 %v5469_v2  ;;  %v1697_v2 = vand.u32 4294901760, %v6718_v7 }
 0x190   :  { %5471 = vmatprep.subr.bf16.mxu0 %v5874_v48 }
 0x193   :  { %5473 = vmatpush3.bf16.msra.mxu0 %v5472_v3 }
 0x194   :  { %5474 = vmatprep.subr.bf16.mxu0 %v5874_v48 }
 0x197   :  { %5476 = vmatpush3.bf16.msra.mxu0 %v5475_v12  ;;  %v1698_v12 = vsub.f32 %v6718_v7, %v1697_v2 }
 0x198   :  { %4884 = vmatprep.subr.mxu0 %v7434_v47 }
 0x199   :  { %v1699_v42 = vand.u32 4294901760, %v1698_v12 }
 0x19b   :  { %4885 = vmatpush3.msra.mxu0 %v1151_v52 }
 0x19c   :  { %4887 = vmatmul.mubr.f32.vlgmr.msra.gmra.mrb[8].mxu0 %v1070_v10  ;;  %5477 = vmatprep.subr.bf16.mxu0 %v5874_v48  ;;  %v2085_v10 = vld [vmem:[%s7360_s7] sm:$0xff] }
 0x19d   :  { %5479 = vmatpush3.bf16.msra.mxu0 %v6481_v1  ;;  %4911 = vmatprep.mubr.msk.f32.mxu0 %vm5875_vm1, %v7434_v47  ;;  %v2098_v19 = vand.u32 4294901760, %v2085_v10 }
 0x19e   :  { %5480 = vmatprep.subr.bf16.mxu0 %v5874_v48 }
 0x19f   :  { %v6775_v52 = vsub.f32 %v2085_v10, %v2098_v19 }
 0x1a1   :  { %5482 = vmatpush3.bf16.msra.mxu0 %v6495_v32 }
 0x1a2   :  { %5483 = vmatprep.subr.bf16.mxu0 %v5874_v48 }
 0x1a5   :  { %5485 = vmatpush3.bf16.msra.mxu0 %v6505_v46 }
 0x1a6   :  { %5486 = vmatprep.subr.bf16.mxu0 %v5874_v48 }
 0x1a9   :  { %5488 = vmatpush3.bf16.msra.mxu0 %v6515_v54 }
 0x1aa   :  { %5489 = vmatprep.subr.bf16.mxu0 %v5874_v48 }
 0x1ad   :  { %5491 = vmatpush3.bf16.msra.mxu0 %v6540_v11 }
 0x1ae   :  { %4909 = vmatprep.subr.mxu0 %v7434_v47 }
 0x1b1   :  { %4910 = vmatpush3.msra.mxu0 %v6555_v27 }
 0x1b2   :  { %4912 = vmatmul.mubr.f32.vlgmr.msra.gmra.mrb[8].mxu0 %v1071_v63  ;;  %5492 = vmatprep.subr.bf16.mxu0 %v5874_v48  ;;  %v2086_v63 = vld [vmem:[%s7360_s7 + $0x8] sm:$0xff] }
 0x1b3   :  { %5494 = vmatpush3.bf16.msra.mxu0 %v5493_v57  ;;  %4936 = vmatprep.mubr.msk.f32.mxu0 %vm5875_vm1, %v7434_v47  ;;  %v2101_v40 = vand.u32 4294901760, %v2086_v63 }
 0x1b4   :  { %5495 = vmatprep.subr.bf16.mxu0 %v5874_v48 }
 0x1b5   :  { %v6785_v44 = vsub.f32 %v2086_v63, %v2101_v40 }
 0x1b7   :  { %5497 = vmatpush3.bf16.msra.mxu0 %v5496_v62  ;;  %v2107_v62 = vand.u32 4294901760, %v2088_v41 }
 0x1b8   :  { %5498 = vmatprep.subr.bf16.mxu0 %v5874_v48 }
 0x1bb   :  { %5500 = vmatpush3.bf16.msra.mxu0 %v5499_v17  ;;  %v2180_v17 = vand.u32 4294901760, %v6775_v52 }
 0x1bc   :  { %5501 = vmatprep.subr.bf16.mxu0 %v5874_v48 }
 0x1bf   :  { %5503 = vmatpush3.bf16.msra.mxu0 %v5502_v60 }
 0x1c0   :  { %5504 = vmatprep.subr.bf16.mxu0 %v5874_v48 }
 0x1c3   :  { %5506 = vmatpush3.bf16.msra.mxu0 %v5505_v51  ;;  %v6791_v51 = vsub.f32 %v2088_v41, %v2107_v62  ;;  %v4402_v41 = vld [vmem:[%s7361_s8] ss:$0 sm:$0xff] }
 0x1c4   :  { %4934 = vmatprep.subr.mxu0 %v7434_v47 }
 0x1c7   :  { %4935 = vmatpush3.msra.mxu0 %v1152_v18  ;;  %v2087_v18 = vld [vmem:[%s7360_s7 + $0x10] sm:$0xff] }
 0x1c8   :  { %4937 = vmatmul.mubr.f32.vlgmr.msra.gmra.mrb[8].mxu0 %v6616_v6  ;;  %5507 = vmatprep.subr.bf16.mxu0 %v5874_v48  ;;  %v2104_v57 = vand.u32 4294901760, %v2087_v18 }
 0x1c9   :  { %5509 = vmatpush3.bf16.msra.mxu0 %v6481_v1  ;;  %4961 = vmatprep.mubr.msk.f32.mxu0 %vm5875_vm1, %v7434_v47  ;;  %v1570_v1 = vld [vmem:[%s7358_s5] sm:$0xff] }
 0x1ca   :  { %5510 = vmatprep.subr.bf16.mxu0 %v5874_v48  ;;  %v6789_v60 = vsub.f32 %v2087_v18, %v2104_v57  ;;  %v5562_v43 = vpack.c.bf16 %v2107_v62, %v2104_v57 }
 0x1cd   :  { %5512 = vmatpush3.bf16.msra.mxu0 %v6495_v32  ;;  %v1571_v32 = vld [vmem:[%s7358_s5 + $0x8] sm:$0xff] }
 0x1ce   :  { %5513 = vmatprep.subr.bf16.mxu0 %v5874_v48 }
 0x1d1   :  { %5515 = vmatpush3.bf16.msra.mxu0 %v6505_v46  ;;  %v1587_v46 = vand.u32 4294901760, %v1570_v1 }
 0x1d2   :  { %5516 = vmatprep.subr.bf16.mxu0 %v5874_v48 }
 0x1d3   :  { %v1668_v8 = vsub.f32 %v1570_v1, %v1587_v46  ;;  %v2187_v1 = vand.u32 4294901760, %v6785_v44 }
 0x1d5   :  { %5518 = vmatpush3.bf16.msra.mxu0 %v6515_v54  ;;  %v1590_v54 = vand.u32 4294901760, %v1571_v32  ;;  %v1669_v58 = vand.u32 4294901760, %v1668_v8 }
 0x1d6   :  { %5519 = vmatprep.subr.bf16.mxu0 %v5874_v48 }
 0x1d7   :  { %v1675_v29 = vsub.f32 %v1571_v32, %v1590_v54  ;;  %v1670_v50 = vsub.f32 %v1668_v8, %v1669_v58  ;;  %v5523_v45 = vpack.c.bf16 %v1590_v54, %v1587_v46  ;;  %v6795_v32 = vpack.c.bf16 %v2101_v40, %v2098_v19  ;;  %v2089_v46 = vld [vmem:[%s7360_s7 + $0x20] sm:$0xff] }
 0x1d8   :  { %v2181_v54 = vsub.f32 %v6775_v52, %v2180_v17 }
 0x1d9   :  { %5521 = vmatpush3.bf16.msra.mxu0 %v6540_v11  ;;  %v1676_v11 = vand.u32 4294901760, %v1675_v29  ;;  %v1671_v35 = vand.u32 4294901760, %v1670_v50  ;;  %v5535_v55 = vpack.c.bf16 %v1675_v29, %v1668_v8  ;;  %v2188_v8 = vsub.f32 %v6785_v44, %v2187_v1 }
 0x1da   :  { %4959 = vmatprep.subr.mxu0 %v7434_v47 }
 0x1db   :  { %v1677_v21 = vsub.f32 %v1675_v29, %v1676_v11  ;;  %v5547_v13 = vpack.c.bf16 %v1676_v11, %v1669_v58  ;;  %v2194_v29 = vand.u32 4294901760, %v6789_v60  ;;  %v2110_v58 = vand.u32 4294901760, %v2089_v46 }
 0x1dc   :  { %v2182_v11 = vand.u32 4294901760, %v2181_v54  ;;  %v2189_v9 = vand.u32 4294901760, %v2188_v8  ;;  %v3084_v54 = vld [vmem:[%s7364_s11 + $0x10] sm:$0xff]  ;;  %v3085_v8 = vld [vmem:[%s7364_s11 + $0x18] sm:$0xff] }
 0x1dd   :  { %4960 = vmatpush3.msra.mxu0 %v6555_v27  ;;  %v1682_v27 = vsub.f32 %v1572_v36, %v1593_v34  ;;  %v1678_v56 = vand.u32 4294901760, %v1677_v21  ;;  %v2201_v36 = vand.u32 4294901760, %v6791_v51  ;;  %v2207_v34 = vsub.f32 %v2089_v46, %v2110_v58 }
 0x1de   :  { %4962 = vmatmul.mubr.f32.vlgmr.msra.gmra.mrb[8].mxu0 %v6616_v6  ;;  %5522 = vmatprep.subr.bf16.mxu0 %v5874_v48  ;;  %v2195_v50 = vsub.f32 %v6789_v60, %v2194_v29 }
 0x1df   :  { %4974 = vmatprep.mubr.msk.f32.mxu0 %vm5875_vm1, %v7434_v47  ;;  %v1683_v61 = vand.u32 4294901760, %v1682_v27  ;;  %v5529_v38 = vpack.c.bf16 %v1678_v56, %v1671_v35  ;;  %5524 = vmatpush3.bf16.msra.mxu0 %v5523_v45  ;;  %v5538_v5 = vpack.c.bf16 %v1689_v23, %v1682_v27  ;;  %v2202_v21 = vsub.f32 %v6791_v51, %v2201_v36 }
 0x1e0   :  { %5525 = vmatprep.subr.bf16.mxu0 %v5874_v48  ;;  %v2196_v23 = vand.u32 4294901760, %v2195_v50  ;;  %v2208_v56 = vand.u32 4294901760, %v2207_v34  ;;  %v5586_v20 = vpack.c.bf16 %v2201_v36, %v2194_v29 }
 0x1e1   :  { %v1684_v0 = vsub.f32 %v1682_v27, %v1683_v61  ;;  %5530 = vmatpush3.bf16.msra.mxu1 %v5529_v38  ;;  %v5550_v24 = vpack.c.bf16 %v1690_v14, %v1683_v61  ;;  %v5565_v27 = vpack.c.bf16 %v2189_v9, %v2182_v11  ;;  %v2203_v35 = vand.u32 4294901760, %v2202_v21 }
 0x1e2   :  { %5531 = vmatprep.subr.bf16.mxu1 %v5874_v48  ;;  %v2209_v14 = vsub.f32 %v2207_v34, %v2208_v56  ;;  %v5571_v38 = vpack.c.bf16 %v6785_v44, %v6775_v52 }
 0x1e3   :  { %v1685_v53 = vand.u32 4294901760, %v1684_v0  ;;  %5527 = vmatpush3.bf16.msra.mxu0 %v5526_v4  ;;  %v5568_v61 = vpack.c.bf16 %v2203_v35, %v2196_v23  ;;  %v5574_v0 = vpack.c.bf16 %v6791_v51, %v6789_v60  ;;  %v3082_v60 = vld [vmem:[%s7364_s11] sm:$0xff]  ;;  %v3083_v51 = vld [vmem:[%s7364_s11 + $0x8] sm:$0xff] }
 0x1e4   :  { %4972 = vmatprep.subr.mxu0 %v7434_v47  ;;  %v2210_v22 = vand.u32 4294901760, %v2209_v14 }
 0x1e5   :  { %v5532_v3 = vpack.c.bf16 %v1692_v25, %v1685_v53  ;;  %v2609_v53 = vld [vmem:[%s7362_s9] sm:$0xff] }
 0x1e6   :  { %v2623_v25 = vand.u32 4294901760, %v2609_v53 }
 0x1e7   :  { %5533 = vmatpush3.bf16.msra.mxu1 %v5532_v3  ;;  %4973 = vmatpush3.msra.mxu0 %v6715_v33 }
 0x1e8   :  { %4985 = vmatprep.subr.mxu1 %v7434_v47  ;;  %5612 = vmatprep.subr.bf16.mxu0 %v5874_v48  ;;  %v2701_v12 = vsub.f32 %v2609_v53, %v2623_v25 }
 0x1eb   :  { %4986 = vmatpush3.msra.mxu1 %v1699_v42 }
 0x1ec   :  { %5534 = vmatprep.subr.bf16.mxu1 %v5874_v48 }
 0x2b1   :  { %v1565_v31 = vpop.f32.mrb[8].mxu0 }
 0x2b2   :  { %v5768_v39 = vadd.f32 %v4400_v30, %v1565_v31  ;;  %v4963_v49 = vpop.f32.mrb[9].mxu0 }
 0x2b4   :  { %5838 = vtanh.f32 %v5768_v39 }
 0x2be   :  { %v5839_v15 = vpop.eup %5838 }
 0x2bf   :  { %v1584_v37 = vsel %vm1582_vm3, %v5839_v15, 0 }
 0x2c0   :  { %v6733_v26 = vand.u32 4294901760, %v1584_v37 }
 0x2c2   :  { %v6736_v28 = vsub.f32 %v1584_v37, %v6733_v26  ;;  %4988 = vmatmul.mubr.f32.vlgmr.msra.gmra.mrb[4].mxu1 %v6733_v26  ;;  %v4401_v37 = vld [vmem:[%s7359_s6] ss:$0 sm:$0xff] }
 0x2c3   :  { %5536 = vmatpush3.bf16.msra.mxu1 %v5535_v55  ;;  %5000 = vmatprep.mubr.msk.f32.mxu1 %vm5875_vm1, %v7434_v47 }
 0x2c4   :  { %5537 = vmatprep.subr.bf16.mxu1 %v5874_v48  ;;  %v6743_v16 = vand.u32 4294901760, %v6736_v28 }
 0x2c6   :  { %v1659_v59 = vsub.f32 %v6736_v28, %v6743_v16 }
 0x2c7   :  { %5539 = vmatpush3.bf16.msra.mxu1 %v5538_v5 }
 0x2c8   :  { %4998 = vmatprep.subr.mxu1 %v7434_v47  ;;  %v6748_v6 = vand.u32 4294901760, %v1659_v59 }
 0x2ca   :  { %4975 = vmatmul.mubr.f32.vlgmr.msra.gmra.mrb[10].mxu0 %v6748_v6 }
 0x2cb   :  { %4999 = vmatpush3.msra.mxu1 %v6718_v7  ;;  %5172 = vmatprep.mubr.msk.f32.mxu0 %vm5875_vm1, %v7434_v47  ;;  %v2610_v7 = vld [vmem:[%s7362_s9 + $0x8] sm:$0xff] }
 0x2cc   :  { %5001 = vmatmul.mubr.f32.vlgmr.msra.gmra.mrb[4].mxu1 %v6736_v28  ;;  %5540 = vmatprep.subr.bf16.mxu1 %v5874_v48 }
 0x2cd   :  { %5542 = vmatpush3.bf16.msra.mxu1 %v5523_v45  ;;  %5013 = vmatprep.mubr.msk.f32.mxu1 %vm5875_vm1, %v7434_v47 }
 0x2ce   :  { %5543 = vmatprep.subr.bf16.mxu1 %v5874_v48 }
 0x2d1   :  { %5545 = vmatpush3.bf16.msra.mxu1 %v5526_v4 }
 0x2d2   :  { %5011 = vmatprep.subr.mxu1 %v7434_v47 }
 0x2d5   :  { %5012 = vmatpush3.msra.mxu1 %v6715_v33 }
 0x2d6   :  { %5014 = vmatmul.mubr.f32.vlgmr.msra.gmra.mrb[4].mxu1 %v6743_v16  ;;  %5546 = vmatprep.subr.bf16.mxu1 %v5874_v48 }
 0x2d7   :  { %5548 = vmatpush3.bf16.msra.mxu1 %v5547_v13  ;;  %5026 = vmatprep.mubr.msk.f32.mxu1 %vm5875_vm1, %v7434_v47 }
 0x2d8   :  { %5549 = vmatprep.subr.bf16.mxu1 %v5874_v48 }
 0x2db   :  { %5551 = vmatpush3.bf16.msra.mxu1 %v5550_v24 }
 0x2dc   :  { %5024 = vmatprep.subr.mxu1 %v7434_v47 }
 0x2df   :  { %5025 = vmatpush3.msra.mxu1 %v1697_v2  ;;  %v2626_v2 = vand.u32 4294901760, %v2610_v7 }
 0x2e0   :  { %5027 = vmatmul.mubr.f32.vlgmr.msra.gmra.mrb[4].mxu1 %v6733_v26  ;;  %5552 = vmatprep.subr.bf16.mxu1 %v5874_v48 }
 0x2e1   :  { %5554 = vmatpush3.bf16.msra.mxu1 %v5523_v45  ;;  %5039 = vmatprep.mubr.msk.f32.mxu1 %vm5875_vm1, %v7434_v47  ;;  %v5595_v3 = vpack.c.bf16 %v2626_v2, %v2623_v25  ;;  %v2708_v42 = vsub.f32 %v2610_v7, %v2626_v2  ;;  %v2702_v45 = vand.u32 4294901760, %v2701_v12 }
 0x2e2   :  { %5555 = vmatprep.subr.bf16.mxu1 %v5874_v48 }
 0x2e3   :  { %v2709_v55 = vand.u32 4294901760, %v2708_v42  ;;  %v5601_v31 = vpack.c.bf16 %v2708_v42, %v2701_v12 }
 0x2e5   :  { %5557 = vmatpush3.bf16.msra.mxu1 %v5526_v4  ;;  %v2703_v4 = vsub.f32 %v2701_v12, %v2702_v45  ;;  %v2710_v5 = vsub.f32 %v2708_v42, %v2709_v55  ;;  %v5607_v39 = vpack.c.bf16 %v2709_v55, %v2702_v45 }
 0x2e6   :  { %5037 = vmatprep.subr.mxu1 %v7434_v47 }
 0x2e7   :  { %v2704_v13 = vand.u32 4294901760, %v2703_v4  ;;  %v2711_v24 = vand.u32 4294901760, %v2710_v5 }
 0x2e9   :  { %5038 = vmatpush3.msra.mxu1 %v6715_v33  ;;  %v5583_v33 = vpack.c.bf16 %v2187_v1, %v2180_v17  ;;  %v5598_v30 = vpack.c.bf16 %v2711_v24, %v2704_v13  ;;  %v3098_v1 = vand.u32 4294901760, %v3082_v60  ;;  %v3597_v24 = vld [vmem:[%s7366_s13 + $0x8] sm:$0xff] }
 0x2ea   :  { %5040 = vmatmul.mubr.f32.vlgmr.msra.gmra.mrb[4].mxu1 %v6733_v26  ;;  %5558 = vmatprep.subr.bf16.mxu1 %v5874_v48 }
 0x2eb   :  { %5560 = vmatpush3.bf16.msra.mxu1 %v6795_v32  ;;  %5052 = vmatprep.mubr.msk.f32.mxu1 %vm5875_vm1, %v7434_v47  ;;  %v6898_v29 = vsub.f32 %v3082_v60, %v3098_v1 }
 0x2ec   :  { %5561 = vmatprep.subr.bf16.mxu1 %v5874_v48 }
 0x2ef   :  { %5563 = vmatpush3.bf16.msra.mxu1 %v5562_v43 }
 0x2f0   :  { %5050 = vmatprep.subr.mxu1 %v7434_v47 }
 0x2f3   :  { %5051 = vmatpush3.msra.mxu1 %v2110_v58 }
 0x2f4   :  { %5053 = vmatmul.mubr.f32.vlgmr.msra.gmra.mrb[6].mxu1 %v6748_v6  ;;  %5564 = vmatprep.subr.bf16.mxu1 %v5874_v48 }
 0x2f5   :  { %5566 = vmatpush3.bf16.msra.mxu1 %v5565_v27  ;;  %5065 = vmatprep.mubr.msk.f32.mxu1 %vm5875_vm1, %v7434_v47  ;;  %v6915_v27 = vld [vmem:[%s7364_s11 + $0x20] sm:$0xff] }
 0x2f6   :  { %5567 = vmatprep.subr.bf16.mxu1 %v5874_v48 }
 0x2f9   :  { %5569 = vmatpush3.bf16.msra.mxu1 %v5568_v61 }
 0x2fa   :  { %5063 = vmatprep.subr.mxu1 %v7434_v47 }
 0x2fd   :  { %5064 = vmatpush3.msra.mxu1 %v2210_v22 }
 0x2fe   :  { %5066 = vmatmul.mubr.f32.vlgmr.msra.gmra.mrb[6].mxu1 %v6733_v26  ;;  %5570 = vmatprep.subr.bf16.mxu1 %v5874_v48 }
 0x2ff   :  { %5572 = vmatpush3.bf16.msra.mxu1 %v5571_v38  ;;  %5078 = vmatprep.mubr.msk.f32.mxu1 %vm5875_vm1, %v7434_v47 }
 0x300   :  { %5573 = vmatprep.subr.bf16.mxu1 %v5874_v48 }
 0x303   :  { %5575 = vmatpush3.bf16.msra.mxu1 %v5574_v0 }
 0x304   :  { %5076 = vmatprep.subr.mxu1 %v7434_v47 }
 0x307   :  { %5077 = vmatpush3.msra.mxu1 %v2207_v34  ;;  %v3180_v34 = vand.u32 4294901760, %v6898_v29 }
 0x308   :  { %5079 = vmatmul.mubr.f32.vlgmr.msra.gmra.mrb[6].mxu1 %v6736_v28  ;;  %5576 = vmatprep.subr.bf16.mxu1 %v5874_v48 }
 0x309   :  { %5578 = vmatpush3.bf16.msra.mxu1 %v6795_v32  ;;  %5091 = vmatprep.mubr.msk.f32.mxu1 %vm5875_vm1, %v7434_v47  ;;  %v3181_v23 = vsub.f32 %v6898_v29, %v3180_v34 }
 0x30a   :  { %5579 = vmatprep.subr.bf16.mxu1 %v5874_v48 }
 0x30b   :  { %v3182_v61 = vand.u32 4294901760, %v3181_v23 }
 0x30d   :  { %5581 = vmatpush3.bf16.msra.mxu1 %v5562_v43 }
 0x30e   :  { %5089 = vmatprep.subr.mxu1 %v7434_v47 }
 0x311   :  { %5090 = vmatpush3.msra.mxu1 %v2110_v58 }
 0x312   :  { %5092 = vmatmul.mubr.f32.vlgmr.msra.gmra.mrb[6].mxu1 %v6743_v16  ;;  %5582 = vmatprep.subr.bf16.mxu1 %v5874_v48 }
 0x313   :  { %5584 = vmatpush3.bf16.msra.mxu1 %v5583_v33  ;;  %5104 = vmatprep.mubr.msk.f32.mxu1 %vm5875_vm1, %v7434_v47 }
 0x314   :  { %5585 = vmatprep.subr.bf16.mxu1 %v5874_v48 }
 0x317   :  { %5587 = vmatpush3.bf16.msra.mxu1 %v5586_v20 }
 0x318   :  { %5102 = vmatprep.subr.mxu1 %v7434_v47 }
 0x31b   :  { %5103 = vmatpush3.msra.mxu1 %v2208_v56  ;;  %v6921_v56 = vand.u32 4294901760, %v6915_v27 }
 0x31c   :  { %5105 = vmatmul.mubr.f32.vlgmr.msra.gmra.mrb[6].mxu1 %v6733_v26  ;;  %5588 = vmatprep.subr.bf16.mxu1 %v5874_v48 }
 0x31d   :  { %5590 = vmatpush3.bf16.msra.mxu1 %v6795_v32  ;;  %5117 = vmatprep.mubr.msk.f32.mxu1 %vm5875_vm1, %v7434_v47  ;;  %v3101_v32 = vand.u32 4294901760, %v3083_v51 }
 0x31e   :  { %5591 = vmatprep.subr.bf16.mxu1 %v5874_v48 }
 0x31f   :  { %v6889_v46 = vpack.c.bf16 %v3101_v32, %v3098_v1  ;;  %v6900_v36 = vsub.f32 %v3083_v51, %v3101_v32 }
 0x321   :  { %5593 = vmatpush3.bf16.msra.mxu1 %v5562_v43  ;;  %5614 = vmatpush3.bf16.msra.mxu0 %v6889_v46  ;;  %v3104_v43 = vand.u32 4294901760, %v3084_v54  ;;  %v3187_v9 = vand.u32 4294901760, %v6900_v36  ;;  %v5625_v2 = vpack.c.bf16 %v6900_v36, %v6898_v29 }
 0x322   :  { %5115 = vmatprep.subr.mxu1 %v7434_v47  ;;  %5615 = vmatprep.subr.bf16.mxu0 %v5874_v48 }
 0x323   :  { %v6908_v50 = vsub.f32 %v3084_v54, %v3104_v43  ;;  %v3188_v35 = vsub.f32 %v6900_v36, %v3187_v9  ;;  %v6935_v12 = vpack.c.bf16 %v3187_v9, %v3180_v34 }
 0x325   :  { %5116 = vmatpush3.msra.mxu1 %v2110_v58  ;;  %v3107_v58 = vand.u32 4294901760, %v3085_v8  ;;  %v3189_v14 = vand.u32 4294901760, %v3188_v35  ;;  %v3194_v22 = vand.u32 4294901760, %v6908_v50 }
 0x326   :  { %5118 = vmatmul.mubr.f32.vlgmr.msra.gmra.mrb[6].mxu1 %v6733_v26  ;;  %5594 = vmatprep.subr.bf16.mxu1 %v5874_v48 }
 0x327   :  { %5124 = vmatprep.mubr.msk.f32.mxu1 %vm5875_vm1, %v7434_v47  ;;  %5596 = vmatpush3.bf16.msra.mxu1 %v5595_v3  ;;  %v6903_v11 = vpack.c.bf16 %v3107_v58, %v3104_v43  ;;  %v6910_v21 = vsub.f32 %v3085_v8, %v3107_v58  ;;  %v6926_v0 = vpack.c.bf16 %v3189_v14, %v3182_v61  ;;  %v4403_v8 = vld [vmem:[%s7363_s10] ss:$0 sm:$0xff] }
 0x328   :  { %5597 = vmatprep.subr.bf16.mxu1 %v5874_v48  ;;  %v3195_v33 = vsub.f32 %v6908_v50, %v3194_v22  ;;  %v3207_v14 = vsub.f32 %v6915_v27, %v6921_v56 }
 0x329   :  { %5617 = vmatpush3.bf16.msra.mxu0 %v6903_v11  ;;  %v3201_v38 = vand.u32 4294901760, %v6910_v21 }
 0x32a   :  { %5170 = vmatprep.subr.mxu0 %v7434_v47  ;;  %v3196_v53 = vand.u32 4294901760, %v3195_v33  ;;  %v3208_v33 = vand.u32 4294901760, %v3207_v14 }
 0x32b   :  { %v3202_v20 = vsub.f32 %v6910_v21, %v3201_v38  ;;  %v6937_v42 = vpack.c.bf16 %v3201_v38, %v3194_v22 }
 0x32d   :  { %5171 = vmatpush3.msra.mxu0 %v6921_v56  ;;  %v3203_v7 = vand.u32 4294901760, %v3202_v20 }
 0x32e   :  { %5618 = vmatprep.subr.bf16.mxu0 %v5874_v48 }
 0x32f   :  { %v5622_v25 = vpack.c.bf16 %v3203_v7, %v3196_v53  ;;  %v3209_v53 = vsub.f32 %v3207_v14, %v3208_v33 }
 0x331   :  { %v3210_v7 = vand.u32 4294901760, %v3209_v53 }
 0x39d   :  { %v1662_v49 = vpop.f32.mrb[10].mxu0 }
 0x39e   :  { %v4976_v15 = vpop.f32.mrb[11].mxu0  ;;  %v1663_v26 = vadd.f32 %v4401_v37, %v1662_v49 }
 0x39f   :  { %v3598_v15 = vld [vmem:[%s7366_s13 + $0x10] sm:$0xff] }
 0x3bd   :  { %v2080_v28 = vpop.f32.mrb[4].mxu1 }
 0x3be   :  { %v5770_v16 = vadd.f32 %v2080_v28, %v1663_v26  ;;  %v5041_v59 = vpop.f32.mrb[5].mxu1  ;;  %v3601_v26 = vld [vmem:[%s7366_s13 + $0x28] sm:$0xff]  ;;  %v3603_v28 = vld [vmem:[%s7366_s13 + $0x38] sm:$0xff] }
 0x3bf   :  { %v3649_v59 = vand.u32 4294901760, %v3601_v26 }
 0x3c0   :  { %5840 = vtanh.f32 %v5770_v16  ;;  %v3647_v16 = vand.u32 4294901760, %v3598_v15 }
 0x3ca   :  { %v5841_v6 = vpop.eup %5840 }
 0x3cb   :  { %v2620_v10 = vsel %vm2618_vm4, %v5841_v6, 0  ;;  %v3653_v6 = vand.u32 4294901760, %v3603_v28 }
 0x3cc   :  { %v2689_v63 = vand.u32 4294901760, %v2620_v10 }
 0x3ce   :  { %v2690_v19 = vsub.f32 %v2620_v10, %v2689_v63  ;;  %v3600_v10 = vld [vmem:[%s7366_s13 + $0x20] sm:$0xff] }
 0x3cf   :  { %v3651_v60 = vand.u32 4294901760, %v3600_v10 }
 0x3d0   :  { %v2691_v40 = vand.u32 4294901760, %v2690_v19 }
 0x3d1   :  { %v6990_v32 = vsub.f32 %v3600_v10, %v3651_v60 }
 0x3d2   :  { %v2692_v52 = vsub.f32 %v2690_v19, %v2691_v40 }
 0x3d4   :  { %v2693_v18 = vand.u32 4294901760, %v2692_v52 }
 0x3d6   :  { %5125 = vmatmul.mubr.f32.vlgmr.msra.gmra.mrb[8].mxu1 %v2693_v18 }
 0x3d7   :  { %5599 = vmatpush3.bf16.msra.mxu1 %v5598_v30  ;;  %5131 = vmatprep.mubr.msk.f32.mxu1 %vm5875_vm1, %v7434_v47  ;;  %v3599_v30 = vld [vmem:[%s7366_s13 + $0x18] sm:$0xff] }
 0x3d8   :  { %5600 = vmatprep.subr.bf16.mxu1 %v5874_v48  ;;  %v3645_v49 = vand.u32 4294901760, %v3599_v30 }
 0x3da   :  { %v6971_v52 = vsub.f32 %v3599_v30, %v3645_v49 }
 0x3de   :  { %5132 = vmatmul.mubr.f32.vlgmr.msra.gmra.mrb[8].mxu1 %v2689_v63 }
 0x3df   :  { %5602 = vmatpush3.bf16.msra.mxu1 %v5601_v31  ;;  %5138 = vmatprep.mubr.msk.f32.mxu1 %vm5875_vm1, %v7434_v47  ;;  %v3596_v31 = vld [vmem:[%s7366_s13] sm:$0xff] }
 0x3e0   :  { %5603 = vmatprep.subr.bf16.mxu1 %v5874_v48  ;;  %v3643_v37 = vand.u32 4294901760, %v3596_v31 }
 0x3e2   :  { %v6973_v18 = vsub.f32 %v3596_v31, %v3643_v37 }
 0x3e6   :  { %5139 = vmatmul.mubr.f32.vlgmr.msra.gmra.mrb[8].mxu1 %v2690_v19 }
 0x3e7   :  { %5605 = vmatpush3.bf16.msra.mxu1 %v5595_v3  ;;  %5145 = vmatprep.mubr.msk.f32.mxu1 %vm5875_vm1, %v7434_v47 }
 0x3e8   :  { %5606 = vmatprep.subr.bf16.mxu1 %v5874_v48 }
 0x3ee   :  { %5146 = vmatmul.mubr.f32.vlgmr.msra.gmra.mrb[8].mxu1 %v2691_v40 }
 0x3ef   :  { %5608 = vmatpush3.bf16.msra.mxu1 %v5607_v39  ;;  %5152 = vmatprep.mubr.msk.f32.mxu1 %vm5875_vm1, %v7434_v47  ;;  %v3641_v39 = vand.u32 4294901760, %v3597_v24 }
 0x3f0   :  { %5609 = vmatprep.subr.bf16.mxu1 %v5874_v48 }
 0x3f1   :  { %v6967_v19 = vpack.c.bf16 %v3645_v49, %v3641_v39  ;;  %v6969_v40 = vsub.f32 %v3597_v24, %v3641_v39  ;;  %v3613_v49 = vld [vmem:[%s7366_s13 + $0x88] sm:$0xff] }
 0x3f6   :  { %5153 = vmatmul.mubr.f32.vlgmr.msra.gmra.mrb[8].mxu1 %v2689_v63 }
 0x3f7   :  { %5611 = vmatpush3.bf16.msra.mxu1 %v5595_v3  ;;  %5159 = vmatprep.mubr.msk.f32.mxu1 %vm5875_vm1, %v7434_v47  ;;  %v5628_v3 = vpack.c.bf16 %v6910_v21, %v6908_v50 }
 0x3f8   :  { %5649 = vmatprep.subr.bf16.mxu1 %v6967_v19 }
 0x3f9   :  { %v2591_v44 = vpop.f32.mrb[6].mxu1 }
 0x3fa   :  { %v5771_v57 = vadd.f32 %v4402_v41, %v2591_v44  ;;  %v5119_v62 = vpop.f32.mrb[7].mxu1  ;;  %v6975_v41 = vpack.c.bf16 %v3647_v16, %v3643_v37  ;;  %v6977_v44 = vsub.f32 %v3598_v15, %v3647_v16  ;;  %v3615_v15 = vld [vmem:[%s7366_s13 + $0x98] sm:$0xff]  ;;  %v3673_v37 = vand.u32 4294901760, %v3613_v49  ;;  %v3614_v16 = vld [vmem:[%s7366_s13 + $0x90] sm:$0xff] }
 0x3fb   :  { %v6981_v62 = vsub.f32 %v3601_v26, %v3649_v59  ;;  %v3677_v26 = vand.u32 4294901760, %v3615_v15 }
 0x3fc   :  { %v2596_v17 = vsel %vm2595_vm5, %v5771_v57, -inf }
 0x3fd   :  { %2597 = vmax.xlane.f32.xlu0 %v2596_v17  ;;  %v6984_v17 = vsub.f32 %v3603_v28, %v3653_v6  ;;  %v3612_v28 = vld [vmem:[%s7366_s13 + $0x80] sm:$0xff]  ;;  %v7090_v10 = vpack.c.bf16 %v3677_v26, %v3673_v37 }
 0x3fe   :  { %5160 = vmatmul.mubr.f32.vlgmr.msra.gmra.mrb[8].mxu1 %v2689_v63  ;;  %v3602_v63 = vld [vmem:[%s7366_s13 + $0x30] sm:$0xff] }
 0x3ff   :  { %3727 = vmatprep.mubr.f32.mxu1 %v7434_v47  ;;  %v3655_v51 = vand.u32 4294901760, %v3602_v63  ;;  %5651 = vmatpush1.bf16.msra.mxu1 %v6975_v41 }
 0x401   :  { %v6988_v1 = vpack.c.bf16 %v3655_v51, %v3651_v60  ;;  %v6992_v54 = vsub.f32 %v3602_v63, %v3655_v51  ;;  %v7433_v63 = vand.u32 4294901760, %v6969_v40  ;;  %v7432_v60 = vand.u32 4294901760, %v6971_v52 }
 0x48a   :  { %v2598_v45 = vpop.xlane.xlu0 %2597 }
 0x48b   :  { %v6939_v55 = vsub.f32 %v5771_v57, %v2598_v45  ;;  %v6979_v57 = vpack.c.bf16 %v3653_v6, %v3649_v59  ;;  %v3611_v45 = vld [vmem:[%s7366_s13 + $0x78] sm:$0xff]  ;;  %v3675_v59 = vand.u32 4294901760, %v3612_v28  ;;  %v3679_v6 = vand.u32 4294901760, %v3614_v16 }
 0x48d   :  { %v2600_v4 = vmul.f32 1.442695, %v6939_v55  ;;  %5653 = vmatprep.subr.bf16.mxu1 %v6979_v57  ;;  %v7094_v51 = vpack.c.bf16 %v3679_v6, %v3675_v59 }
 0x48e   :  { %5655 = vmatpush1.bf16.msra.mxu1 %v6988_v1 }
 0x48f   :  { %5842 = vpow2.f32 %v2600_v4  ;;  %v3669_v4 = vand.u32 4294901760, %v3611_v45 }
 0x499   :  { %v5843_v5 = vpop.eup %5842 }
 0x49a   :  { %v2602_v13 = vsel %vm2595_vm5, %v5843_v5, 0.0  ;;  %v3608_v5 = vld [vmem:[%s7366_s13 + $0x60] sm:$0xff] }
 0x49b   :  { %2603 = vadd.xlane.f32.xlu0 %v2602_v13  ;;  %v3610_v13 = vld [vmem:[%s7366_s13 + $0x70] sm:$0xff]  ;;  %v3667_v24 = vand.u32 4294901760, %v3608_v5 }
 0x49c   :  { %v3671_v30 = vand.u32 4294901760, %v3610_v13 }
 0x49e   :  { %v7074_v39 = vpack.c.bf16 %v3671_v30, %v3667_v24  ;;  %v7126_v53 = vsub.f32 %v3610_v13, %v3671_v30  ;;  %v7421_v13 = vand.u32 4294901760, %v6992_v54 }
 0x4d1   :  { %v3077_v43 = vpop.f32.mrb[8].mxu1 }
 0x4d2   :  { %v5772_v58 = vadd.f32 %v4403_v8, %v3077_v43  ;;  %v5161_v34 = vpop.f32.mrb[9].mxu1  ;;  %v7431_v8 = vand.u32 4294901760, %v6973_v18  ;;  %v3742_v43 = vsub.f32 %v6969_v40, %v7433_v63 }
 0x4d3   :  { %v7430_v34 = vand.u32 4294901760, %v6977_v44 }
 0x4d4   :  { %v3081_v9 = vmax.f32 %v5772_v58, 0.0  ;;  %v3754_v58 = vsub.f32 %v6971_v52, %v7432_v60 }
 0x4d6   :  { %v3095_v23 = vsel %vm1582_vm3, %v3081_v9, 0 }
 0x4d7   :  { %v3167_v35 = vand.u32 4294901760, %v3095_v23 }
 0x4d9   :  { %v3168_v61 = vsub.f32 %v3095_v23, %v3167_v35 }
 0x4db   :  { %v3169_v22 = vand.u32 4294901760, %v3168_v61 }
 0x4dd   :  { %v3170_v38 = vsub.f32 %v3168_v61, %v3169_v22 }
 0x4df   :  { %v3171_v20 = vand.u32 4294901760, %v3170_v38 }
 0x4e1   :  { %5173 = vmatmul.mubr.f32.vlgmr.msra.gmra.mrb[12].mxu0 %v3171_v20  ;;  %v7124_v20 = vsub.f32 %v3608_v5, %v3667_v24 }
 0x4e2   :  { %5620 = vmatpush3.bf16.msra.mxu0 %v6926_v0  ;;  %5185 = vmatprep.mubr.msk.f32.mxu0 %vm5875_vm1, %v7434_v47  ;;  %v3606_v0 = vld [vmem:[%s7366_s13 + $0x50] sm:$0xff] }
 0x4e3   :  { %5621 = vmatprep.subr.bf16.mxu0 %v5874_v48 }
 0x4e6   :  { %5623 = vmatpush3.bf16.msra.mxu0 %v5622_v25 }
 0x4e7   :  { %5183 = vmatprep.subr.mxu0 %v7434_v47 }
 0x4ea   :  { %5184 = vmatpush3.msra.mxu0 %v3210_v7  ;;  %v7128_v7 = vsub.f32 %v3613_v49, %v3673_v37 }
 0x4eb   :  { %5186 = vmatmul.mubr.f32.vlgmr.msra.gmra.mrb[12].mxu0 %v3167_v35  ;;  %5624 = vmatprep.subr.bf16.mxu0 %v5874_v48 }
 0x4ec   :  { %5626 = vmatpush3.bf16.msra.mxu0 %v5625_v2  ;;  %5198 = vmatprep.mubr.msk.f32.mxu0 %vm5875_vm1, %v7434_v47  ;;  %v3663_v2 = vand.u32 4294901760, %v3606_v0 }
 0x4ed   :  { %5627 = vmatprep.subr.bf16.mxu0 %v5874_v48 }
 0x4f0   :  { %5629 = vmatpush3.bf16.msra.mxu0 %v5628_v3 }
 0x4f1   :  { %5196 = vmatprep.subr.mxu0 %v7434_v47 }
 0x4f4   :  { %5197 = vmatpush3.msra.mxu0 %v3207_v14  ;;  %v3617_v14 = vld [vmem:[%s7366_s13 + $0xa8] sm:$0x3] }
 0x4f5   :  { %5199 = vmatmul.mubr.f32.vlgmr.msra.gmra.mrb[12].mxu0 %v3168_v61  ;;  %5630 = vmatprep.subr.bf16.mxu0 %v5874_v48  ;;  %v7111_v61 = vsub.f32 %v3606_v0, %v3663_v2  ;;  %v3748_v0 = vsub.f32 %v6973_v18, %v7431_v8 }
 0x4f6   :  { %5632 = vmatpush3.bf16.msra.mxu0 %v6889_v46  ;;  %5211 = vmatprep.mubr.msk.f32.mxu0 %vm5875_vm1, %v7434_v47 }
 0x4f7   :  { %5633 = vmatprep.subr.bf16.mxu0 %v5874_v48 }
 0x4fa   :  { %5635 = vmatpush3.bf16.msra.mxu0 %v6903_v11 }
 0x4fb   :  { %5209 = vmatprep.subr.mxu0 %v7434_v47 }
 0x4fe   :  { %5210 = vmatpush3.msra.mxu0 %v6921_v56 }
 0x4ff   :  { %5212 = vmatmul.mubr.f32.vlgmr.msra.gmra.mrb[12].mxu0 %v3169_v22  ;;  %5636 = vmatprep.subr.bf16.mxu0 %v5874_v48  ;;  %v3616_v22 = vld [vmem:[%s7366_s13 + $0xa0] sm:$0x3] }
 0x500   :  { %5638 = vmatpush3.bf16.msra.mxu0 %v6935_v12  ;;  %5224 = vmatprep.mubr.msk.f32.mxu0 %vm5875_vm1, %v7434_v47 }
 0x501   :  { %5639 = vmatprep.subr.bf16.mxu0 %v5874_v48 }
 0x504   :  { %5641 = vmatpush3.bf16.msra.mxu0 %v6937_v42  ;;  %v3609_v42 = vld [vmem:[%s7366_s13 + $0x68] sm:$0xff] }
 0x505   :  { %5222 = vmatprep.subr.mxu0 %v7434_v47 }
 0x508   :  { %5223 = vmatpush3.msra.mxu0 %v3208_v33  ;;  %v7122_v33 = vsub.f32 %v3611_v45, %v3669_v4  ;;  %v7426_v45 = vand.u32 4294901760, %v6984_v17 }
 0x509   :  { %5225 = vmatmul.mubr.f32.vlgmr.msra.gmra.mrb[12].mxu0 %v3167_v35  ;;  %5642 = vmatprep.subr.bf16.mxu0 %v5874_v48 }
 0x50a   :  { %5644 = vmatpush3.bf16.msra.mxu0 %v6889_v46  ;;  %5237 = vmatprep.mubr.msk.f32.mxu0 %vm5875_vm1, %v7434_v47  ;;  %v3605_v46 = vld [vmem:[%s7366_s13 + $0x48] sm:$0xff]  ;;  %v3778_v30 = vsub.f32 %v6984_v17, %v7426_v45 }
 0x50b   :  { %5645 = vmatprep.subr.bf16.mxu0 %v5874_v48  ;;  %v3607_v48 = vld [vmem:[%s7366_s13 + $0x58] sm:$0xff] }
 0x50c   :  { %v3661_v27 = vand.u32 4294901760, %v3607_v48 }
 0x50e   :  { %5647 = vmatpush3.bf16.msra.mxu0 %v6903_v11  ;;  %v3657_v11 = vand.u32 4294901760, %v3605_v46  ;;  %v7107_v23 = vsub.f32 %v3607_v48, %v3661_v27  ;;  %v3743_v48 = vand.u32 4294901760, %v3742_v43 }
 0x50f   :  { %5235 = vmatprep.subr.mxu0 %v7434_v47 }
 0x510   :  { %v7054_v3 = vpack.c.bf16 %v3661_v27, %v3657_v11  ;;  %v7105_v9 = vsub.f32 %v3605_v46, %v3657_v11  ;;  %v7140_v46 = vsel %vm3634_vm6, %v3616_v22, 0  ;;  %v3755_v11 = vand.u32 4294901760, %v3754_v58 }
 0x512   :  { %5236 = vmatpush3.msra.mxu0 %v6921_v56  ;;  %v3604_v56 = vld [vmem:[%s7366_s13 + $0x40] sm:$0xff]  ;;  %5657 = vmatprep.subr.bf16.mxu1 %v7054_v3 }
 0x513   :  { %5238 = vmatmul.mubr.f32.vlgmr.msra.gmra.mrb[12].mxu0 %v3167_v35  ;;  %v3659_v25 = vand.u32 4294901760, %v3604_v56 }
 0x515   :  { %v7056_v12 = vpack.c.bf16 %v3663_v2, %v3659_v25  ;;  %v7109_v35 = vsub.f32 %v3604_v56, %v3659_v25  ;;  %v7146_v56 = vand.u32 4294901760, %v7140_v46  ;;  %v3760_v25 = vsub.f32 %v6977_v44, %v7430_v34 }
 0x516   :  { %v5668_v2 = vpack.c.bf16 %v3755_v11, %v3743_v48  ;;  %v7415_v11 = vand.u32 4294901760, %v7111_v61 }
 0x517   :  { %5659 = vmatpush1.bf16.msra.mxu1 %v7056_v12  ;;  %v3761_v5 = vand.u32 4294901760, %v3760_v25 }
 0x528   :  { %v2604_v29 = vpop.xlane.xlu0 %2603 }
 0x529   :  { %5844 = vlog2.f32 %v2604_v29  ;;  %v7130_v29 = vsub.f32 %v3615_v15, %v3677_v26  ;;  %v7419_v15 = vand.u32 4294901760, %v7105_v9  ;;  %v3784_v26 = vsub.f32 %v6992_v54, %v7421_v13 }
 0x52b   :  { %v3790_v58 = vsub.f32 %v7105_v9, %v7419_v15 }
 0x52d   :  { %v3791_v25 = vand.u32 4294901760, %v3790_v58  ;;  %v7424_v58 = vand.u32 4294901760, %v7126_v53 }
 0x533   :  { %v5845_v36 = vpop.eup %5844 }
 0x534   :  { %v2606_v50 = vmul.f32 0.6931472, %v5845_v36  ;;  %v7132_v36 = vsub.f32 %v3612_v28, %v3675_v59  ;;  %v7418_v28 = vand.u32 4294901760, %v7107_v23 }
 0x536   :  { %v2607_v21 = vsub.f32 %v6939_v55, %v2606_v50  ;;  %v3665_v55 = vand.u32 4294901760, %v3609_v42  ;;  %v7134_v50 = vsub.f32 %v3614_v16, %v3679_v6  ;;  %v7414_v16 = vand.u32 4294901760, %v7109_v35 }
 0x537   :  { %v3779_v6 = vand.u32 4294901760, %v3778_v30  ;;  %v3802_v22 = vsub.f32 %v7107_v23, %v7418_v28 }
 0x538   :  { %2608 = vst.msk [vmem:[#allocation2] sm:$0x3] %vm2595_vm5, %v2607_v21  ;;  %v7072_v31 = vpack.c.bf16 %v3669_v4, %v3665_v55  ;;  %v7120_v38 = vsub.f32 %v3609_v42, %v3665_v55  ;;  %7508 = vst [vmem:[#allocation8_spill] sm:$0xff] %v7134_v50  ;;  %v7137_v21 = vsel %vm3634_vm6, %v3617_v14, 0  ;;  %v7427_v42 = vand.u32 4294901760, %v6981_v62 }
 0x539   :  { %v7143_v27 = vand.u32 4294901760, %v7137_v21  ;;  %v7422_v55 = vand.u32 4294901760, %v6990_v32  ;;  %v3749_v4 = vand.u32 4294901760, %v3748_v0  ;;  %v3785_v14 = vand.u32 4294901760, %v3784_v26 }
 0x53a   :  { %5661 = vmatprep.subr.bf16.mxu1 %v7072_v31  ;;  %v3766_v24 = vsub.f32 %v6981_v62, %v7427_v42  ;;  %v3796_v48 = vsub.f32 %v7109_v35, %v7414_v16 }
 0x53b   :  { %5663 = vmatpush1.bf16.msra.mxu1 %v7074_v39  ;;  %v3772_v49 = vsub.f32 %v6990_v32, %v7422_v55  ;;  %v7170_v37 = vpack.c.bf16 %v3761_v5, %v3749_v4  ;;  %v7417_v4 = vand.u32 4294901760, %v7122_v33 }
 0x53c   :  { %5665 = vmatprep.subr.bf16.mxu1 %v7090_v10  ;;  %v3767_v59 = vand.u32 4294901760, %v3766_v24  ;;  %v3803_v24 = vand.u32 4294901760, %v3802_v22  ;;  %v3797_v30 = vand.u32 4294901760, %v3796_v48  ;;  %v7425_v22 = vand.u32 4294901760, %v7130_v29 }
 0x53d   :  { %v3773_v43 = vand.u32 4294901760, %v3772_v49  ;;  %v3808_v49 = vsub.f32 %v7111_v61, %v7415_v11 }
 0x53e   :  { %v5672_v0 = vpack.c.bf16 %v3779_v6, %v3767_v59  ;;  %v3826_v59 = vsub.f32 %v7122_v33, %v7417_v4  ;;  %v7420_v6 = vand.u32 4294901760, %v7124_v20  ;;  %v5676_v16 = vpack.c.bf16 %v3803_v24, %v3791_v25 }
 0x53f   :  { %5667 = vmatpush1.bf16.msra.mxu1 %v7094_v51  ;;  %v5674_v5 = vpack.c.bf16 %v3785_v14, %v3773_v43  ;;  %v3809_v43 = vand.u32 4294901760, %v3808_v49  ;;  %v7423_v14 = vand.u32 4294901760, %v7128_v7  ;;  %v3832_v4 = vsub.f32 %v7126_v53, %v7424_v58 }
 0x540   :  { %3682 = vmatprep.subr.mxu1 %v7143_v27  ;;  %v3827_v11 = vand.u32 4294901760, %v3826_v59  ;;  %v3850_v24 = vsub.f32 %v7130_v29, %v7425_v22  ;;  %v7429_v49 = vand.u32 4294901760, %v7132_v36 }
 0x541   :  { %v5678_v28 = vpack.c.bf16 %v3809_v43, %v3797_v30  ;;  %v3838_v25 = vsub.f32 %v7128_v7, %v7423_v14  ;;  %v3833_v15 = vand.u32 4294901760, %v3832_v4  ;;  %v5692_v4 = vpack.c.bf16 %v6984_v17, %v6981_v62 }
 0x542   :  { %v3851_v55 = vand.u32 4294901760, %v3850_v24  ;;  %v3844_v30 = vsub.f32 %v7132_v36, %v7429_v49 }
 0x543   :  { %3684 = vmatpush1.msra.mxu1 %v7146_v56  ;;  %v3839_v13 = vand.u32 4294901760, %v3838_v25  ;;  %v4404_v25 = vld [vmem:[%s7365_s12] ss:$0 sm:$0xff]  ;;  %s5877_s12 = smov [#allocation2]  }
 0x544   :  { %5669 = vmatprep.subr.bf16.mxu1 %v5668_v2  ;;  %v7416_v2 = vand.u32 4294901760, %v7120_v38  ;;  %v3845_v22 = vand.u32 4294901760, %v3844_v30  ;;  %s4388_s1 = sshll.u32 %s5877_s12, 4  ;;  %s4389_s1 = int_to_ptr.vmem [resolvable:$true] %s4388_s1 }
 0x545   :  { %v5684_v58 = vpack.c.bf16 %v3851_v55, %v3839_v13  ;;  %v5698_v55 = vpack.c.bf16 %v7111_v61, %v7109_v35  ;;  %v5702_v13 = vpack.c.bf16 %v7126_v53, %v7124_v20  ;;  %s5850_s4 = scalar_lea.vmem %s4389_s1, 32  ;;  %p5855_p1 = scmp.lt.s32.totalorder %s4389_s1, %s4389_s1 }
 0x546   :  { %v3814_v26 = vsub.f32 %v7120_v38, %v7416_v2  ;;  %v3820_v2 = vsub.f32 %v7124_v20, %v7420_v6  ;;  %v7428_v6 = vand.u32 4294901760, %v7134_v50  ;;  %p5851_p0 = scmp.ne.s32.totalorder %s4389_s1, %s5850_s4  ;;  %p5856_p2 = scmp.lt.s32.totalorder %s5850_s4, %s5850_s4 }
 0x548   :  { %v3815_v48 = vand.u32 4294901760, %v3814_v26  ;;  %v3821_v59 = vand.u32 4294901760, %v3820_v2  ;;  %v3856_v14 = vsub.f32 %v7134_v50, %v7428_v6  ;;  %v5690_v2 = vpack.c.bf16 %v6977_v44, %v6973_v18  ;;  %p5857_p3 = por %p5856_p2, %p5855_p1 }
 0x54a   :  { %v5680_v26 = vpack.c.bf16 %v3827_v11, %v3815_v48  ;;  %v5682_v43 = vpack.c.bf16 %v3833_v15, %v3821_v59  ;;  %v3857_v45 = vand.u32 4294901760, %v3856_v14  ;;  %v5688_v11 = vpack.c.bf16 %v6971_v52, %v6969_v40  ;;  %p5858_p4 = pnand %p5857_p3, %p5851_p0 }
 0x54b   :  { %v5694_v15 = vpack.c.bf16 %v6992_v54, %v6990_v32  ;;  %v5696_v48 = vpack.c.bf16 %v7107_v23, %v7105_v9  ;;  %v5704_v14 = vpack.c.bf16 %v7130_v29, %v7128_v7 }
 0x54c   :  { %v5686_v42 = vpack.c.bf16 %v3857_v45, %v3845_v22  ;;  %v5700_v45 = vpack.c.bf16 %v7122_v33, %v7120_v38  ;;  %v5706_v22 = vpack.c.bf16 %v7134_v50, %v7132_v36  ;;  %v7509_v50 = vmov 0.0  }
 0x5e6   :  { %v3591_v24 = vpop.f32.mrb[12].mxu0 }
 0x5e7   :  { %v5773_v59 = vadd.f32 %v4404_v25, %v3591_v24  ;;  %v5239_v30 = vpop.f32.mrb[13].mxu0  ;;  %v7252_v25 = vsub.f32 %v7137_v21, %v7143_v27 }
 0x5e9   :  { %v3595_v6 = vmax.f32 %v5773_v59, 0.0 }
 0x5eb   :  { %v3632_v49 = vsel %vm3630_vm7, %v3595_v6, 0  ;;  %v7256_v6 = vsub.f32 %v7140_v46, %v7146_v56  ;;  %v7511_v46 = vand.u32 4294901760, %v6971_v52  ;;  %v7517_v52 = vand.u32 4294901760, %v6992_v54 }
 0x5ec   :  { %v7245_v34 = vand.u32 4294901760, %v3632_v49  ;;  %v7523_v54 = vand.u32 4294901760, %v7122_v33 }
 0x5ee   :  { %v3729_v8 = vsub.f32 %v3632_v49, %v7245_v34  ;;  %v3861_v49 = vand.u32 4294901760, %v7252_v25 }
 0x5f0   :  { %v3730_v60 = vand.u32 4294901760, %v3729_v8 }
 0x5f2   :  { %v3731_v63 = vsub.f32 %v3729_v8, %v3730_v60 }
 0x5f4   :  { %v3732_v47 = vand.u32 4294901760, %v3731_v63  ;;  %v3862_v63 = vsub.f32 %v7252_v25, %v3861_v49 }
 0x5f6   :  { %3733 = vmatmul.mubr.f32.vlgmr.msra.gmra.mrb[10].mxu1 %v3732_v47  ;;  %v3867_v47 = vand.u32 4294901760, %v7256_v6  ;;  %v3863_v21 = vand.u32 4294901760, %v3862_v63 }
 0x5f7   :  { %5671 = vmatpush1.bf16.msra.mxu1 %v7170_v37  ;;  %3913 = vmatprep.mubr.f32.mxu1 %v7509_v50 }
 0x5f8   :  { %5673 = vmatprep.subr.bf16.mxu1 %v5672_v0  ;;  %v3868_v37 = vsub.f32 %v7256_v6, %v3867_v47 }
 0x5fa   :  { %v3869_v0 = vand.u32 4294901760, %v3868_v37 }
 0x5fb   :  { %5675 = vmatpush1.bf16.msra.mxu1 %v5674_v5 }
 0x5fc   :  { %5677 = vmatprep.subr.bf16.mxu1 %v5676_v16  ;;  %v7513_v16 = vand.u32 4294901760, %v6977_v44  ;;  %v7519_v44 = vand.u32 4294901760, %v7107_v23  ;;  %v7526_v23 = vand.u32 4294901760, %v7128_v7 }
 0x5ff   :  { %5679 = vmatpush1.bf16.msra.mxu1 %v5678_v28  ;;  %v7512_v28 = vand.u32 4294901760, %v6973_v18  ;;  %v7518_v18 = vand.u32 4294901760, %v7105_v9  ;;  %v7525_v9 = vand.u32 4294901760, %v7126_v53 }
 0x600   :  { %5681 = vmatprep.subr.bf16.mxu1 %v5680_v26  ;;  %v7515_v26 = vand.u32 4294901760, %v6984_v17  ;;  %v7520_v17 = vand.u32 4294901760, %v7109_v35  ;;  %v7527_v35 = vand.u32 4294901760, %v7130_v29 }
 0x601   :  { %v5730_v5 = vpack.c.bf16 %v7513_v16, %v7512_v28 }
 0x603   :  { %5683 = vmatpush1.bf16.msra.mxu1 %v5682_v43 }
 0x604   :  { %5685 = vmatprep.subr.bf16.mxu1 %v5684_v58  ;;  %v7514_v58 = vand.u32 4294901760, %v6981_v62  ;;  %v5736_v62 = vpack.c.bf16 %v7519_v44, %v7518_v18 }
 0x606   :  { %v5732_v43 = vpack.c.bf16 %v7515_v26, %v7514_v58 }
 0x607   :  { %5687 = vmatpush1.bf16.msra.mxu1 %v5686_v42 }
 0x608   :  { %3864 = vmatprep.subr.mxu1 %v3863_v21 }
 0x60b   :  { %3870 = vmatpush1.msra.mxu1 %v3869_v0 }
 0x60c   :  { %3915 = vmatmul.mubr.f32.vlgmr.msra.gmra.mrb[10].mxu1 %v7245_v34  ;;  %5689 = vmatprep.subr.bf16.mxu1 %v5688_v11 }
 0x60d   :  { %5691 = vmatpush1.bf16.msra.mxu1 %v5690_v2  ;;  %4029 = vmatprep.mubr.f32.mxu1 %v7509_v50 }
 0x60e   :  { %5693 = vmatprep.subr.bf16.mxu1 %v5692_v4 }
 0x611   :  { %5695 = vmatpush1.bf16.msra.mxu1 %v5694_v15  ;;  %v7524_v15 = vand.u32 4294901760, %v7124_v20 }
 0x612   :  { %5697 = vmatprep.subr.bf16.mxu1 %v5696_v48 }
 0x613   :  { %v5742_v48 = vpack.c.bf16 %v7525_v9, %v7524_v15 }
 0x615   :  { %5699 = vmatpush1.bf16.msra.mxu1 %v5698_v55  ;;  %v5744_v55 = vpack.c.bf16 %v7527_v35, %v7526_v23 }
 0x616   :  { %5701 = vmatprep.subr.bf16.mxu1 %v5700_v45  ;;  %v7529_v45 = vld [vmem:[#allocation8_spill] sm:$0xff] }
 0x619   :  { %5703 = vmatpush1.bf16.msra.mxu1 %v5702_v13 }
 0x61a   :  { %5705 = vmatprep.subr.bf16.mxu1 %v5704_v14 }
 0x61d   :  { %5707 = vmatpush1.bf16.msra.mxu1 %v5706_v22 }
 0x61e   :  { %3983 = vmatprep.subr.mxu1 %v7252_v25 }
 0x621   :  { %3986 = vmatpush1.msra.mxu1 %v7256_v6 }
 0x622   :  { %4032 = vmatmul.mubr.f32.vlgmr.msra.gmra.mrb[10].mxu1 %v3729_v8  ;;  %5709 = vmatprep.subr.bf16.mxu1 %v6967_v19  ;;  %v7510_v8 = vand.u32 4294901760, %v6969_v40  ;;  %v7516_v40 = vand.u32 4294901760, %v6990_v32  ;;  %v7522_v32 = vand.u32 4294901760, %v7120_v38  ;;  %v7530_v38 = vand.u32 4294901760, %v7529_v45 }
 0x623   :  { %5711 = vmatpush1.bf16.msra.mxu1 %v6975_v41  ;;  %4124 = vmatprep.mubr.f32.mxu1 %v7509_v50 }
 0x624   :  { %5713 = vmatprep.subr.bf16.mxu1 %v6979_v57  ;;  %v5728_v42 = vpack.c.bf16 %v7511_v46, %v7510_v8  ;;  %v5734_v11 = vpack.c.bf16 %v7517_v52, %v7516_v40  ;;  %v5740_v4 = vpack.c.bf16 %v7523_v54, %v7522_v32 }
 0x627   :  { %5715 = vmatpush1.bf16.msra.mxu1 %v6988_v1 }
 0x628   :  { %5717 = vmatprep.subr.bf16.mxu1 %v7054_v3 }
 0x62b   :  { %5719 = vmatpush1.bf16.msra.mxu1 %v7056_v12 }
 0x62c   :  { %5721 = vmatprep.subr.bf16.mxu1 %v7072_v31 }
 0x62f   :  { %5723 = vmatpush1.bf16.msra.mxu1 %v7074_v39 }
 0x630   :  { %5725 = vmatprep.subr.bf16.mxu1 %v7090_v10 }
 0x633   :  { %5727 = vmatpush1.bf16.msra.mxu1 %v7094_v51 }
 0x634   :  { %4079 = vmatprep.subr.mxu1 %v7143_v27 }
 0x637   :  { %4081 = vmatpush1.msra.mxu1 %v7146_v56 }
 0x638   :  { %4128 = vmatmul.mubr.f32.vlgmr.msra.gmra.mrb[10].mxu1 %v3730_v60  ;;  %5729 = vmatprep.subr.bf16.mxu1 %v5728_v42  ;;  %v7521_v60 = vand.u32 4294901760, %v7111_v61  ;;  %v7528_v61 = vand.u32 4294901760, %v7132_v36 }
 0x639   :  { %5731 = vmatpush1.bf16.msra.mxu1 %v5730_v5  ;;  %4264 = vmatprep.mubr.f32.mxu1 %v7509_v50 }
 0x63a   :  { %5733 = vmatprep.subr.bf16.mxu1 %v5732_v43  ;;  %v5738_v2 = vpack.c.bf16 %v7521_v60, %v7520_v17  ;;  %v5746_v13 = vpack.c.bf16 %v7530_v38, %v7528_v61 }
 0x63d   :  { %5735 = vmatpush1.bf16.msra.mxu1 %v5734_v11 }
 0x63e   :  { %5737 = vmatprep.subr.bf16.mxu1 %v5736_v62 }
 0x641   :  { %5739 = vmatpush1.bf16.msra.mxu1 %v5738_v2 }
 0x642   :  { %5741 = vmatprep.subr.bf16.mxu1 %v5740_v4 }
 0x645   :  { %5743 = vmatpush1.bf16.msra.mxu1 %v5742_v48 }
 0x646   :  { %5745 = vmatprep.subr.bf16.mxu1 %v5744_v55 }
 0x649   :  { %5747 = vmatpush1.bf16.msra.mxu1 %v5746_v13 }
 0x64a   :  { %4217 = vmatprep.subr.mxu1 %v3861_v49 }
 0x64d   :  { %4221 = vmatpush1.msra.mxu1 %v3867_v47 }
 0x64e   :  { %4266 = vmatmul.mubr.f32.vlgmr.msra.gmra.mrb[10].mxu1 %v7245_v34  ;;  %5749 = vmatprep.subr.bf16.mxu1 %v6967_v19 }
 0x64f   :  { %5751 = vmatpush1.bf16.msra.mxu1 %v6975_v41  ;;  %4358 = vmatprep.mubr.f32.mxu1 %v7509_v50 }
 0x650   :  { %5753 = vmatprep.subr.bf16.mxu1 %v6979_v57 }
 0x653   :  { %5755 = vmatpush1.bf16.msra.mxu1 %v6988_v1 }
 0x654   :  { %5757 = vmatprep.subr.bf16.mxu1 %v7054_v3 }
 0x657   :  { %5759 = vmatpush1.bf16.msra.mxu1 %v7056_v12 }
 0x658   :  { %5761 = vmatprep.subr.bf16.mxu1 %v7072_v31 }
 0x65b   :  { %5763 = vmatpush1.bf16.msra.mxu1 %v7074_v39 }
 0x65c   :  { %5765 = vmatprep.subr.bf16.mxu1 %v7090_v10 }
 0x65f   :  { %5767 = vmatpush1.bf16.msra.mxu1 %v7094_v51 }
 0x660   :  { %4313 = vmatprep.subr.mxu1 %v7143_v27 }
 0x663   :  { %4315 = vmatpush1.msra.mxu1 %v7146_v56 }
 0x664   :  { %4360 = vmatmul.mubr.f32.vlgmr.msra.gmra.mrb[10].mxu1 %v7245_v34 }
 0x665   :  { %5861 = shalt.err (!%p5858_p4)
}
 0x666   :  { %s5862_s30 = scalar_lea.hbm %s7369_s16, 32 }
 0x667   :  { %p5863_p5 = scmp.ne.s32.totalorder %s7369_s16, %s5862_s30  ;;  %p5866_p6 = scmp.lt.u32.totalorder %s5862_s30, %s7369_s16 }
 0x669   :  { %p5868_p7 = pnand %p5866_p6, %p5863_p5 }
 0x66b   :  { %5871 = shalt.err (!%p5868_p7)
}
 0x66c   :  { %4391 = dma.vmem_to_hbm [thread:$0]  %s4389_s1, 32, %s7369_s16, [#allocation3]   ;;  %v3620_v19 = vlaneseq  ;;  %v3618_v1 = vld [vmem:[%s7367_s14] sm:$0x3] }
 0x66e   :  { %v3621_v41 = vshrl.u32 %v3620_v19, 7 }
 0x670   :  { %v3622_v57 = vsub.s32 0, %v3621_v41  ;;  %v3626_v3 = vsub.s32 1, %v3621_v41 }
 0x672   :  { %v3623_v12 = vrot.slane %v3618_v1, %v3622_v57  ;;  %v3627_v31 = vrot.slane %v3618_v1, %v3626_v3 }
 0x737   :  { %v4361_v39 = vpop.f32.mrb[10].mxu1 }
 0x738   :  { %v5774_v10 = vadd.f32 %v4361_v39, %v3623_v12  ;;  %v4363_v51 = vpop.f32.mrb[11].mxu1 }
 0x739   :  { %v5775_v34 = vadd.f32 %v4363_v51, %v3627_v31 }
 0x73a   :  { %5846 = vtanh.f32 %v5774_v10 }
 0x73b   :  { %5848 = vtanh.f32 %v5775_v34 }
 0x744   :  { %v5847_v33 = vpop.eup %5846 }
 0x745   :  { %v5849_v20 = vpop.eup %5848 }
 0x746   :  { %v4370_v53 = vcombine.low %v5847_v33, %v5849_v20 }
 0x748   :  { %4405 = vst.sshfl [vmem:[%s7368_s15] sm:$0x33 pattern:$0x76325410] %v4370_v53 }
 0x749   :  { %5872 = dma.done.wait [#allocation3], 32  }
 0x74a   :  { %5873 = vsyncadd [#allocation3], 4294967264 }
 0x74b   :  { %4397 = vsyncpa [#allocation3], 1 }

</bundles_post_ra>
